<compile_context>
chip_gen: v7x
topology: tpu7x:2x2x1
jax: 0.10.0
libtpu: 0.0.40
codegen_flags: <defaults>
</compile_context>

<pallas_src>
import functools
import math

import jax
import jax.numpy as jnp
from jax.experimental import pallas as pl
from jax.experimental.pallas import tpu as pltpu


NUM_ENCODING_FUNCTIONS = 6
INCLUDE_INPUT = True
LOG_SAMPLING = True
NORMALIZE = False


def _frequency_bands(num_encoding_functions, log_sampling):
    # Matches torch init: 2.0 ** linspace(0, F-1, F) for log_sampling=True.
    if log_sampling:
        bands = 2.0 ** jnp.linspace(0.0, num_encoding_functions - 1,
                                    num_encoding_functions)
    else:
        bands = jnp.linspace(2.0 ** 0.0,
                             2.0 ** (num_encoding_functions - 1),
                             num_encoding_functions)
    return [float(b) for b in bands]


def _round_up(x, m):
    return ((x + m - 1) // m) * m


def _pe_kernel(x_ref, o_ref, *, num_freqs, include_input, log_sampling,
               normalization, freqs):
    # x_ref: (block_n, D) ; o_ref: (block_n, D * (include_input + 2*F))
    x = x_ref[...].astype(jnp.float32)
    parts = [x] if include_input else []

    if log_sampling:
        # Frequencies are exact powers of two: 2 transcendentals total, the
        # remaining octaves come from the double-angle recurrence on the VPU
        # (4 VALU slots) instead of the single EUP slot.
        s = jnp.sin(x)
        c = jnp.cos(x)
        for k in range(num_freqs):
            if k > 0:
                s, c = 2.0 * s * c, c * c - s * s
            if normalization is not None:
                parts.append(normalization[k] * s)
                parts.append(normalization[k] * c)
            else:
                parts.append(s)
                parts.append(c)
    else:
        # General (non power-of-two) frequencies: direct evaluation.
        for k, f in enumerate(freqs):
            xf = x * f
            s = jnp.sin(xf)
            c = jnp.cos(xf)
            if normalization is not None:
                s = normalization[k] * s
                c = normalization[k] * c
            parts.append(s)
            parts.append(c)

    enc = jnp.concatenate(parts, axis=-1) if len(parts) > 1 else parts[0]
    o_ref[...] = enc.astype(o_ref.dtype)


def positional_encoding(x, *, block_n=2048, out_dtype=None,
                        num_encoding_functions=NUM_ENCODING_FUNCTIONS,
                        include_input=INCLUDE_INPUT,
                        log_sampling=LOG_SAMPLING,
                        normalize=NORMALIZE):
    """x: (..., D) -> (..., D * (include_input + 2*F)).

    Channel ordering matches the PyTorch module:
      [x, sin(f0*x), cos(f0*x), sin(f1*x), cos(f1*x), ...]
    """
    out_dtype = x.dtype if out_dtype is None else out_dtype
    freqs = _frequency_bands(num_encoding_functions, log_sampling)
    normalization = [1.0 / f for f in freqs] if normalize else None

    orig_shape = x.shape
    d = orig_shape[-1]
    n = int(math.prod(orig_shape[:-1]))
    x2 = x.reshape(n, d)

    n_terms = (1 if include_input else 0) + 2 * num_encoding_functions
    d_out = d * n_terms

    # Large tiles amortize per-grid-step overhead; clamp for small inputs and
    # pad N so any flattened batch size works (pad rows are sliced off).
    bn = min(int(block_n), _round_up(n, 8))
    bn = max(8, _round_up(bn, 8))
    n_pad = _round_up(n, bn)
    if n_pad != n:
        x2 = jnp.pad(x2, ((0, n_pad - n), (0, 0)))
    num_blocks = n_pad // bn

    kernel = functools.partial(
        _pe_kernel,
        num_freqs=num_encoding_functions,
        include_input=include_input,
        log_sampling=log_sampling,
        normalization=normalization,
        freqs=freqs,
    )

    out2 = pl.pallas_call(
        kernel,
        out_shape=jax.ShapeDtypeStruct((n_pad, d_out), out_dtype),
        grid_spec=pltpu.PrefetchScalarGridSpec(
            num_scalar_prefetch=0,
            grid=(num_blocks,),
            in_specs=[pl.BlockSpec((bn, d), lambda i: (i, 0))],
            out_specs=pl.BlockSpec((bn, d_out), lambda i: (i, 0)),
        ),
        compiler_params=pltpu.CompilerParams(
            dimension_semantics=("parallel",)),
    )(x2)

    if n_pad != n:
        out2 = out2[:n]
    return out2.reshape(*orig_shape[:-1], d_out)


def positional_encoding_ref(x, num_encoding_functions=NUM_ENCODING_FUNCTIONS,
                            include_input=INCLUDE_INPUT,
                            log_sampling=LOG_SAMPLING,
                            normalize=NORMALIZE):
    """Pure-JAX reference mirroring the PyTorch forward (direct sin/cos)."""
    freqs = _frequency_bands(num_encoding_functions, log_sampling)
    enc = [x] if include_input else []
    for k, f in enumerate(freqs):
        s = jnp.sin(x * f)
        c = jnp.cos(x * f)
        if normalize:
            s = s / f
            c = c / f
        enc.append(s)
        enc.append(c)
    return jnp.concatenate(enc, axis=-1) if len(enc) > 1 else enc[0]


if __name__ == "__main__":
    key = jax.random.PRNGKey(0)
    k1, k2, k3 = jax.random.split(key, 3)

    n_terms = 1 + 2 * NUM_ENCODING_FUNCTIONS  # 13

    # 1) ImplicitAdaptiveOctantNet applies the encoding to `coords` with
    #    batch == 1 and in_features == 4  ->  encoded dim 4 * 13 = 52.
    coords = jax.random.normal(k1, (1, 64, 4), dtype=jnp.float32)
    out1 = jax.block_until_ready(positional_encoding(coords))
    ref1 = positional_encoding_ref(coords)
    assert out1.shape == (1, 64, 4 * n_terms)
    assert jnp.allclose(out1, ref1, atol=1e-4, rtol=1e-4), (
        float(jnp.max(jnp.abs(out1 - ref1))))

    # 2) Non-divisible flattened batch + multi-step grid (exercises padding
    #    and the pipelined grid path with a small forced block).
    coords2 = jax.random.normal(k2, (1, 100, 4), dtype=jnp.float32)
    out2 = jax.block_until_ready(positional_encoding(coords2, block_n=16))
    ref2 = positional_encoding_ref(coords2)
    assert out2.shape == (1, 100, 4 * n_terms)
    assert jnp.allclose(out2, ref2, atol=1e-4, rtol=1e-4), (
        float(jnp.max(jnp.abs(out2 - ref2))))

    # 3) Default PositionalEncoding input_dim=3 with multiple leading dims.
    x3 = jax.random.normal(k3, (2, 8, 3), dtype=jnp.float32)
    out3 = jax.block_until_ready(positional_encoding(x3))
    ref3 = positional_encoding_ref(x3)
    assert out3.shape == (2, 8, 3 * n_terms)
    assert jnp.allclose(out3, ref3, atol=1e-4, rtol=1e-4), (
        float(jnp.max(jnp.abs(out3 - ref3))))

    print("KERNEL_OK")
</pallas_src>

<mosaic_0001>
module attributes {stable_mosaic.version = 11 : i64} {
  func.func @_pe_kernel(%arg0: i32, %arg1: memref<64x4xf32, #tpu.memory_space<vmem>>, %arg2: memref<64x52xf32, #tpu.memory_space<vmem>>) attributes {dimension_semantics = [#tpu.dimension_semantics<parallel>], iteration_bounds = array<i64: 1>, scalar_prefetch = 0 : i64, scratch_operands = 0 : i64, tpu.core_type = #tpu.core_type<tc>, window_params = [{transform_indices = @transform_0, window_bounds = array<i64: 64, 4>}, {transform_indices = @transform_1, window_bounds = array<i64: 64, 52>}]} {
    %c0 = arith.constant 0 : index
    %c0_0 = arith.constant 0 : index
    %0 = vector.load %arg1[%c0, %c0_0] : memref<64x4xf32, #tpu.memory_space<vmem>>, vector<64x4xf32>
    %1 = math.sin %0 : vector<64x4xf32>
    %2 = math.cos %0 : vector<64x4xf32>
    %cst = arith.constant 2.000000e+00 : f32
    %3 = vector.broadcast %cst : f32 to vector<64x4xf32>
    %4 = arith.mulf %3, %1 : vector<64x4xf32>
    %5 = arith.mulf %4, %2 : vector<64x4xf32>
    %6 = arith.mulf %2, %2 : vector<64x4xf32>
    %7 = arith.mulf %1, %1 : vector<64x4xf32>
    %8 = arith.subf %6, %7 : vector<64x4xf32>
    %cst_1 = arith.constant 2.000000e+00 : f32
    %9 = vector.broadcast %cst_1 : f32 to vector<64x4xf32>
    %10 = arith.mulf %9, %5 : vector<64x4xf32>
    %11 = arith.mulf %10, %8 : vector<64x4xf32>
    %12 = arith.mulf %8, %8 : vector<64x4xf32>
    %13 = arith.mulf %5, %5 : vector<64x4xf32>
    %14 = arith.subf %12, %13 : vector<64x4xf32>
    %cst_2 = arith.constant 2.000000e+00 : f32
    %15 = vector.broadcast %cst_2 : f32 to vector<64x4xf32>
    %16 = arith.mulf %15, %11 : vector<64x4xf32>
    %17 = arith.mulf %16, %14 : vector<64x4xf32>
    %18 = arith.mulf %14, %14 : vector<64x4xf32>
    %19 = arith.mulf %11, %11 : vector<64x4xf32>
    %20 = arith.subf %18, %19 : vector<64x4xf32>
    %cst_3 = arith.constant 2.000000e+00 : f32
    %21 = vector.broadcast %cst_3 : f32 to vector<64x4xf32>
    %22 = arith.mulf %21, %17 : vector<64x4xf32>
    %23 = arith.mulf %22, %20 : vector<64x4xf32>
    %24 = arith.mulf %20, %20 : vector<64x4xf32>
    %25 = arith.mulf %17, %17 : vector<64x4xf32>
    %26 = arith.subf %24, %25 : vector<64x4xf32>
    %cst_4 = arith.constant 2.000000e+00 : f32
    %27 = vector.broadcast %cst_4 : f32 to vector<64x4xf32>
    %28 = arith.mulf %27, %23 : vector<64x4xf32>
    %29 = arith.mulf %28, %26 : vector<64x4xf32>
    %30 = arith.mulf %26, %26 : vector<64x4xf32>
    %31 = arith.mulf %23, %23 : vector<64x4xf32>
    %32 = arith.subf %30, %31 : vector<64x4xf32>
    %33 = tpu.concatenate %0, %1, %2, %5, %8, %11, %14, %17, %20, %23, %26, %29, %32 in 1 : vector<64x4xf32>, vector<64x4xf32>, vector<64x4xf32>, vector<64x4xf32>, vector<64x4xf32>, vector<64x4xf32>, vector<64x4xf32>, vector<64x4xf32>, vector<64x4xf32>, vector<64x4xf32>, vector<64x4xf32>, vector<64x4xf32>, vector<64x4xf32> -> vector<64x52xf32>
    %c0_5 = arith.constant 0 : index
    %c0_6 = arith.constant 0 : index
    %34 = vector.load %arg2[%c0_5, %c0_6] : memref<64x52xf32, #tpu.memory_space<vmem>>, vector<64x52xf32>
    tpu.vector_store %arg2[%c0_5, %c0_6], %33 {strides = array<i32>} : memref<64x52xf32, #tpu.memory_space<vmem>>, vector<64x52xf32>,
    return
  }
  func.func @transform_0(%arg0: i32) -> (i32, i32) {
    %c0_i32 = arith.constant 0 : i32
    %c0_i32_0 = arith.constant 0 : i32
    return %arg0, %c0_i32 : i32, i32
  }
  func.func @transform_1(%arg0: i32) -> (i32, i32) {
    %c0_i32 = arith.constant 0 : i32
    %c0_i32_0 = arith.constant 0 : i32
    return %arg0, %c0_i32 : i32, i32
  }
}

</mosaic_0001>

<bundles_post_ra>
// kernel: tpu_custom_call.1
= control target key start
LH: loop header
LB: loop body
LE: loop exit
PB: predicated region body
PF: predicated region fallthrough
CT: control target
= control target key end

     0   :  { %v2531_v27 = vmov 683565275   ;;  %v2532_v29 = vmov 2475754826   ;;  %v2533_v31 = vmov 2131351028   ;;  %s4038_s0 = inlined_call_operand.vmem [shape: f32[64,4], index: 0, kind: input, shape index: {}]   ;;  %s4039_s1 = inlined_call_operand.vmem [shape: f32[64,52], index: 1, kind: output, shape index: {}]  }
   0x1   :  { %v2562_v0 = vld [vmem:[%s4038_s0 + $0x10] sm:$0xff]  ;;  %v2569_v3 = vld [vmem:[%s4038_s0] sm:$0xff]  ;;  %v2574_v4 = vld [vmem:[%s4038_s0 + $0x18] sm:$0xff]  ;;  %v4049_v33 = vmov 2102212464   ;;  %s2537_s16 = smov 4  }
   0x2   :  { %v224_v1 = vand.u32 2147483647, %v2562_v0  ;;  %v227_v2 = vand.u32 2139095040, %v2562_v0  ;;  %v16_v7 = vand.u32 2147483647, %v2569_v3  ;;  %v19_v8 = vand.u32 2139095040, %v2569_v3 }
   0x3   :  { %v331_v10 = vand.u32 2139095040, %v2574_v4  ;;  %v328_v22 = vand.u32 2147483647, %v2574_v4  ;;  %v2535_v35 = vmov 920167782   ;;  %vm226_vm13 = vcmp.lt.s32.totalorder %v2562_v0, 0 }
   0x4   :  { %v228_v5 = vshrl.u32 %v227_v2, 23  ;;  %v231_v6 = vand.u32 8388607, %v224_v1  ;;  %v20_v11 = vshrl.u32 %v19_v8, 23  ;;  %v23_v12 = vand.u32 8388607, %v16_v7 }
   0x5   :  { %v332_v17 = vshrl.u32 %v331_v10, 23  ;;  %v2536_v42 = vmov 1326507024   ;;  %s2538_s23 = smov 8   ;;  %s2539_s24 = smov 12  }
   0x6   :  { %v2385_v9 = vadd.s32 4294967169, %v228_v5  ;;  %v232_v14 = vor.u32 8388608, %v231_v6  ;;  %v2377_v15 = vadd.s32 4294967169, %v20_v11  ;;  %v24_v16 = vor.u32 8388608, %v23_v12  ;;  %s2540_s25 = smov 16   ;;  %s2541_s26 = smov 20  }
   0x7   :  { %v2588_v25 = vadd.s32 4294967169, %v332_v17  ;;  %s2542_s27 = smov 24   ;;  %s2543_s28 = smov 28  }
   0x8   :  { %v234_v13 = vadd.s32 1, %v2385_v9  ;;  %v26_v19 = vadd.s32 1, %v2377_v15  ;;  %v2584_v23 = vshll.u32 %v232_v14, 8  ;;  %v2586_v24 = vshll.u32 %v24_v16, 8  ;;  %s2544_s29 = smov 32   ;;  %s2545_s30 = smov 36  }
   0x9   :  { %s2546_s10 = smov 40   ;;  %s2547_s15 = smov 44  }
   0xa   :  { %vm235_vm0 = vcmp.gt.s32.totalorder %v234_v13, 0  ;;  %vm27_vm1 = vcmp.gt.s32.totalorder %v26_v19, 0 }
   0xb   :  { %v236_v18 = vsel %vm235_vm0, %v234_v13, 0  ;;  %v28_v47 = vsel %vm27_vm1, %v26_v19, 0 }
   0xc   :  { %v237_v20 = vshrl.u32 %v236_v18, 5  ;;  %v238_v21 = vand.u32 31, %v236_v18  ;;  %v29_v50 = vshrl.u32 %v28_v47, 5  ;;  %v30_v51 = vand.u32 31, %v28_v47 }
   0xe   :  { %v239_v26 = vsub.s32 32, %v238_v21  ;;  %v241_v28 = vshll.u32 %v2531_v27, %v238_v21  ;;  %v244_v30 = vshll.u32 %v2532_v29, %v238_v21  ;;  %v247_v32 = vshll.u32 %v2533_v31, %v238_v21 }
   0xf   :  { %v250_v34 = vshll.u32 %v4049_v33, %v238_v21  ;;  %v253_v36 = vshll.u32 %v2535_v35, %v238_v21  ;;  %vm256_vm2 = vcmp.lt.s32.totalorder %v237_v20, 1  ;;  %vm257_vm3 = vcmp.lt.s32.totalorder %v237_v20, 2 }
  0x10   :  { %v240_v37 = vshrl.u32 %v2531_v27, %v239_v26  ;;  %v242_v38 = vshrl.u32 %v2532_v29, %v239_v26  ;;  %v245_v39 = vshrl.u32 %v2533_v31, %v239_v26  ;;  %v248_v40 = vshrl.u32 %v4049_v33, %v239_v26 }
  0x11   :  { %v251_v41 = vshrl.u32 %v2535_v35, %v239_v26  ;;  %v254_v43 = vshrl.u32 %v2536_v42, %v239_v26  ;;  %vm258_vm4 = vcmp.lt.s32.totalorder %v237_v20, 3  ;;  %vm259_vm5 = vcmp.lt.s32.totalorder %v237_v20, 4 }
  0x12   :  { %v243_v44 = vor.u32 %v242_v38, %v241_v28  ;;  %v246_v45 = vor.u32 %v245_v39, %v244_v30  ;;  %v249_v46 = vor.u32 %v248_v40, %v247_v32  ;;  %v31_v59 = vsub.s32 32, %v30_v51 }
  0x13   :  { %v252_v48 = vor.u32 %v251_v41, %v250_v34  ;;  %v255_v49 = vor.u32 %v254_v43, %v253_v36  ;;  %v33_v63 = vshll.u32 %v2531_v27, %v30_v51  ;;  %v36_v14 = vshll.u32 %v2532_v29, %v30_v51 }
  0x14   :  { %v260_v52 = vsel %vm256_vm2, %v240_v37, %v243_v44  ;;  %v261_v53 = vsel %vm259_vm5, %v249_v46, 2102212464  ;;  %v264_v54 = vsel %vm256_vm2, %v243_v44, %v246_v45  ;;  %v268_v55 = vsel %vm256_vm2, %v246_v45, %v249_v46 }
  0x15   :  { %v262_v56 = vsel %vm258_vm4, %v246_v45, %v261_v53  ;;  %v265_v57 = vsel %vm259_vm5, %v252_v48, 920167782  ;;  %v269_v58 = vsel %vm259_vm5, %v255_v49, 1326507024  ;;  %v32_v8 = vshrl.u32 %v2531_v27, %v31_v59 }
  0x16   :  { %v263_v60 = vsel %vm257_vm3, %v260_v52, %v262_v56  ;;  %v266_v61 = vsel %vm258_vm4, %v249_v46, %v265_v57  ;;  %v270_v62 = vsel %vm258_vm4, %v252_v48, %v269_v58  ;;  %v34_v13 = vshrl.u32 %v2532_v29, %v31_v59 }
  0x17   :  { %v267_v2 = vsel %vm257_vm3, %v264_v54, %v266_v61  ;;  %v271_v5 = vsel %vm257_vm3, %v268_v55, %v270_v62  ;;  %v279_v6 = vmul.u32 %v2584_v23, %v263_v60  ;;  %v37_v15 = vshrl.u32 %v2533_v31, %v31_v59  ;;  %v2651_v55 = vld [vmem:[%s4038_s0 + $0x8] sm:$0xff] }
  0x18   :  { %v2615_v9 = vmul.u32.u64.low %v2584_v23, %v271_v5  ;;  %v2616_v10 = vmul.u32.u64.high %v2584_v23, %v271_v5, %v2615_v9  ;;  %v2619_v11 = vmul.u32.u64.low %v2584_v23, %v267_v2  ;;  %v2620_v12 = vmul.u32.u64.high %v2584_v23, %v267_v2, %v2619_v11 }
  0x19   :  { %v39_v16 = vshll.u32 %v2533_v31, %v30_v51  ;;  %v40_v17 = vshrl.u32 %v4049_v33, %v31_v59  ;;  %v42_v18 = vshll.u32 %v4049_v33, %v30_v51  ;;  %v43_v19 = vshrl.u32 %v2535_v35, %v31_v59 }
  0x1a   :  { %v45_v20 = vshll.u32 %v2535_v35, %v30_v51  ;;  %v35_v21 = vor.u32 %v34_v13, %v33_v63  ;;  %v38_v23 = vor.u32 %v37_v15, %v36_v14  ;;  %v46_v26 = vshrl.u32 %v2536_v42, %v31_v59 }
  0x1b   :  { %vm48_vm6 = vcmp.lt.s32.totalorder %v29_v50, 1  ;;  %vm281_vm7 = vc.u32 %v2616_v10, %v2619_v11  ;;  %v282_v28 = vadd.s32 1, %v2620_v12  ;;  %v41_v30 = vor.u32 %v40_v17, %v39_v16 }
  0x1c   :  { %v338_v32 = vadd.s32 1, %v2588_v25  ;;  %v44_v34 = vor.u32 %v43_v19, %v42_v18  ;;  %v47_v36 = vor.u32 %v46_v26, %v45_v20  ;;  %vm49_vm8 = vcmp.lt.s32.totalorder %v29_v50, 2 }
  0x1d   :  { %vm50_vm9 = vcmp.lt.s32.totalorder %v29_v50, 3  ;;  %v283_v37 = vsel %vm281_vm7, %v282_v28, %v2620_v12  ;;  %vm51_vm10 = vcmp.lt.s32.totalorder %v29_v50, 4  ;;  %v52_v38 = vsel %vm48_vm6, %v32_v8, %v35_v21 }
  0x1e   :  { %v56_v39 = vsel %vm48_vm6, %v35_v21, %v38_v23  ;;  %v284_v40 = vadd.s32 %v283_v37, %v279_v6  ;;  %v53_v41 = vsel %vm51_vm10, %v41_v30, 2102212464  ;;  %v57_v43 = vsel %vm51_vm10, %v44_v34, 920167782 }
  0x1f   :  { %v60_v44 = vsel %vm48_vm6, %v38_v23, %v41_v30  ;;  %v54_v45 = vsel %vm50_vm9, %v38_v23, %v53_v41  ;;  %v58_v46 = vsel %vm50_vm9, %v41_v30, %v57_v43  ;;  %v61_v47 = vsel %vm51_vm10, %v47_v36, 1326507024 }
  0x20   :  { %vm339_vm11 = vcmp.gt.s32.totalorder %v338_v32, 0  ;;  %v285_v25 = vadd.s32 536870912, %v284_v40  ;;  %v59_v48 = vsel %vm49_vm8, %v56_v39, %v58_v46  ;;  %v62_v49 = vsel %vm50_vm9, %v44_v34, %v61_v47 }
  0x21   :  { %v55_v51 = vsel %vm49_vm8, %v52_v38, %v54_v45  ;;  %v63_v52 = vsel %vm49_vm8, %v60_v44, %v62_v49  ;;  %v2644_v53 = vmul.u32.u64.low %v2586_v24, %v59_v48  ;;  %v2645_v54 = vmul.u32.u64.high %v2586_v24, %v59_v48, %v2644_v53 }
  0x22   :  { %v286_v56 = vshrl.u32 %v285_v25, 30  ;;  %v2654_v57 = vmul.u32.u64.low %v2586_v24, %v63_v52  ;;  %v2655_v58 = vmul.u32.u64.high %v2586_v24, %v63_v52, %v2654_v57  ;;  %v340_v59 = vsel %vm339_vm11, %v338_v32, 0 }
  0x23   :  { %v335_v50 = vand.u32 8388607, %v328_v22  ;;  %v342_v60 = vand.u32 31, %v340_v59  ;;  %v71_v62 = vmul.u32 %v2586_v24, %v55_v51  ;;  %v123_v63 = vand.u32 2139095040, %v2651_v55 }
  0x24   :  { %v287_v61 = vshll.u32 %v286_v56, 30  ;;  %v74_v2 = vadd.s32 1, %v2645_v54  ;;  %vm73_vm12 = vc.u32 %v2655_v58, %v2644_v53  ;;  %v120_v12 = vand.u32 2147483647, %v2651_v55 }
  0x25   :  { %v343_v6 = vsub.s32 32, %v342_v60  ;;  %v336_v9 = vor.u32 8388608, %v335_v50  ;;  %v341_v14 = vshrl.u32 %v340_v59, 5  ;;  %v124_v15 = vshrl.u32 %v123_v63, 23 }
  0x26   :  { %v2662_v5 = vsub.s32 %v284_v40, %v287_v61  ;;  %v75_v8 = vsel %vm73_vm12, %v74_v2, %v2645_v54  ;;  %v310_v16 = vsub.s32 4, %v286_v56  ;;  %v345_v17 = vshll.u32 %v2531_v27, %v342_v60 }
  0x27   :  { %v76_v24 = vadd.s32 %v75_v8, %v71_v62  ;;  %v348_v18 = vshll.u32 %v2532_v29, %v342_v60  ;;  %v354_v19 = vshll.u32 %v4049_v33, %v342_v60  ;;  %v346_v23 = vshrl.u32 %v2532_v29, %v343_v6 }
  0x28   :  { %v290_v13 = vsub.s32 0, %v2662_v5  ;;  %v349_v26 = vshrl.u32 %v2533_v31, %v343_v6  ;;  %v351_v28 = vshll.u32 %v2533_v31, %v342_v60  ;;  %v352_v30 = vshrl.u32 %v4049_v33, %v343_v6 }
  0x29   :  { %v77_v21 = vadd.s32 536870912, %v76_v24  ;;  %v355_v32 = vshrl.u32 %v2535_v35, %v343_v6  ;;  %v2679_v34 = vshll.u32 %v336_v9, 8  ;;  %v280_v36 = vadd.s32 %v2619_v11, %v2616_v10 }
  0x2a   :  { %v2386_v20 = vmin.u32 %v290_v13, %v2662_v5  ;;  %v357_v38 = vshll.u32 %v2535_v35, %v342_v60  ;;  %v358_v39 = vshrl.u32 %v2536_v42, %v343_v6  ;;  %v311_v40 = vsel %vm226_vm13, %v310_v16, %v286_v56 }
  0x2b   :  { %v2687_v41 = vshrl.u32 %v77_v21, 30  ;;  %v356_v43 = vor.u32 %v355_v32, %v354_v19  ;;  %v2381_v44 = vadd.s32 4294967169, %v124_v15  ;;  %v347_v46 = vor.u32 %v346_v23, %v345_v17 }
  0x2c   :  { %v292_v37 = vclz %v2386_v20  ;;  %v350_v47 = vor.u32 %v349_v26, %v348_v18  ;;  %vm363_vm14 = vcmp.lt.s32.totalorder %v341_v14, 4  ;;  %v344_v10 = vshrl.u32 %v2531_v27, %v343_v6 }
  0x2d   :  { %v79_v25 = vshll.u32 %v2687_v41, 30  ;;  %v353_v11 = vor.u32 %v352_v30, %v351_v28  ;;  %vm360_vm15 = vcmp.lt.s32.totalorder %v341_v14, 1  ;;  %v359_v48 = vor.u32 %v358_v39, %v357_v38 }
  0x2e   :  { %v2387_v45 = vadd.s32 4294967294, %v292_v37  ;;  %vm362_vm1 = vcmp.lt.s32.totalorder %v341_v14, 3  ;;  %v369_v49 = vsel %vm363_vm14, %v356_v43, 920167782  ;;  %vm361_vm2 = vcmp.lt.s32.totalorder %v341_v14, 2 }
  0x2f   :  { %v2692_v52 = vsub.s32 %v76_v24, %v79_v25  ;;  %v365_v54 = vsel %vm363_vm14, %v353_v11, 2102212464  ;;  %v368_v50 = vsel %vm360_vm15, %v347_v46, %v350_v47  ;;  %v364_v61 = vsel %vm360_vm15, %v344_v10, %v347_v46 }
  0x30   :  { %vm2388_vm0 = vcmp.lt.s32.totalorder %v2387_v45, 0  ;;  %v370_v62 = vsel %vm362_vm1, %v353_v11, %v369_v49  ;;  %v372_v63 = vsel %vm360_vm15, %v350_v47, %v353_v11  ;;  %v366_v8 = vsel %vm362_vm1, %v350_v47, %v365_v54 }
  0x31   :  { %v295_v51 = vsel %vm2388_vm0, 0, %v2387_v45  ;;  %v82_v60 = vsub.s32 0, %v2692_v52  ;;  %v373_v9 = vsel %vm363_vm14, %v359_v48, 1326507024  ;;  %vm2705_vm3 = vcmp.le.f32.partialorder %v224_v1, 0.7853982 }
  0x32   :  { %v296_v56 = vsub.s32 32, %v295_v51  ;;  %v297_v57 = vshll.u32 %v2662_v5, %v295_v51  ;;  %v300_v59 = vsub.s32 4294967266, %v295_v51  ;;  %v371_v24 = vsel %vm361_vm2, %v368_v50, %v370_v62 }
  0x33   :  { %v2378_v13 = vmin.u32 %v82_v60, %v2692_v52  ;;  %v374_v15 = vsel %vm362_vm1, %v356_v43, %v373_v9  ;;  %v130_v19 = vadd.s32 1, %v2381_v44  ;;  %v2715_v20 = vsel %vm2705_vm3, 0, %v311_v40 }
  0x34   :  { %v298_v2 = vshrl.u32 %v280_v36, %v296_v56  ;;  %v301_v6 = vadd.s32 127, %v300_v59  ;;  %v375_v18 = vsel %vm361_vm2, %v372_v63, %v374_v15  ;;  %v367_v1 = vsel %vm361_vm2, %v364_v61, %v366_v8 }
  0x35   :  { %v84_v21 = vclz %v2378_v13  ;;  %v2720_v23 = vand.u32 8388607, %v120_v12  ;;  %v2723_v30 = vmul.u32.u64.low %v2679_v34, %v375_v18  ;;  %v2724_v32 = vmul.u32.u64.high %v2679_v34, %v375_v18, %v2723_v30 }
  0x36   :  { %v299_v16 = vor.u32 %v298_v2, %v297_v57  ;;  %v302_v17 = vshll.u32 %v301_v6, 23  ;;  %v2727_v37 = vmul.u32.u64.low %v2679_v34, %v371_v24  ;;  %v2728_v38 = vmul.u32.u64.high %v2679_v34, %v371_v24, %v2727_v37 }
  0x37   :  { %v2379_v36 = vadd.s32 4294967294, %v84_v21  ;;  %vm131_vm4 = vcmp.gt.s32.totalorder %v130_v19, 0  ;;  %v317_v14 = vadd.s32 3, %v2715_v20  ;;  %vm18_vm5 = vcmp.lt.s32.totalorder %v2569_v3, 0 }
  0x38   :  { %v303_v26 = vor.u32 4788187, %v302_v17  ;;  %v306_v28 = vcvt.s32.f32 %v299_v16  ;;  %v132_v40 = vsel %vm131_vm4, %v130_v19, 0  ;;  %v72_v43 = vadd.s32 %v2644_v53, %v2655_v58 }
  0x39   :  { %vm2380_vm6 = vcmp.lt.s32.totalorder %v2379_v36, 0  ;;  %v128_v44 = vor.u32 8388608, %v2720_v23  ;;  %v134_v45 = vand.u32 31, %v132_v40  ;;  %v383_v25 = vmul.u32 %v2679_v34, %v367_v1 }
  0x3a   :  { %v304_v39 = vand.u32 2147483647, %v303_v26  ;;  %v87_v47 = vsel %vm2380_vm6, 0, %v2379_v36  ;;  %vm385_vm7 = vc.u32 %v2724_v32, %v2727_v37  ;;  %v386_v49 = vadd.s32 1, %v2728_v38 }
  0x3b   :  { %v88_v10 = vsub.s32 32, %v87_v47  ;;  %v89_v11 = vshll.u32 %v2692_v52, %v87_v47  ;;  %v92_v48 = vsub.s32 4294967266, %v87_v47  ;;  %v2741_v54 = vand.u32 3, %v317_v14 }
  0x3c   :  { %v307_v46 = vmul.f32 %v306_v28, %v304_v39  ;;  %v102_v53 = vsub.s32 4, %v2687_v41  ;;  %v135_v58 = vsub.s32 32, %v134_v45  ;;  %v387_v59 = vsel %vm385_vm7, %v386_v49, %v2728_v38 }
  0x3d   :  { %v90_v56 = vshrl.u32 %v72_v43, %v88_v10  ;;  %v93_v57 = vadd.s32 127, %v92_v48  ;;  %v2745_v34 = vshrl.u32 %v132_v40, 5  ;;  %vm2751_vm8 = vcmp.le.f32.partialorder %v16_v7, 0.7853982 }
  0x3e   :  { %v308_v51 = vxor.u32 2147483648, %v307_v46  ;;  %v388_v60 = vadd.s32 %v387_v59, %v383_v25  ;;  %v137_v61 = vshll.u32 %v2531_v27, %v134_v45  ;;  %v140_v62 = vshll.u32 %v2532_v29, %v134_v45 }
  0x3f   :  { %v91_v2 = vor.u32 %v90_v56, %v89_v11  ;;  %v94_v6 = vshll.u32 %v93_v57, 23  ;;  %v143_v8 = vshll.u32 %v2533_v31, %v134_v45  ;;  %v138_v7 = vshrl.u32 %v2532_v29, %v135_v58 }
  0x40   :  { %v309_v50 = vsel %vm226_vm13, %v308_v51, %v307_v46  ;;  %v389_v9 = vadd.s32 536870912, %v388_v60  ;;  %v141_v13 = vshrl.u32 %v2533_v31, %v135_v58  ;;  %v144_v16 = vshrl.u32 %v4049_v33, %v135_v58 }
  0x41   :  { %v312_v63 = vsel %vm2705_vm3, %v2562_v0, %v309_v50  ;;  %v95_v24 = vor.u32 4788187, %v94_v6  ;;  %v98_v15 = vcvt.s32.f32 %v91_v2  ;;  %v103_v5 = vsel %vm18_vm5, %v102_v53, %v2687_v41  ;;  %v2828_v6 = vld [vmem:[%s4038_s0 + $0x28] sm:$0xff] }
  0x42   :  { %2491 = vcosq.f32 %v312_v63  ;;  %v2767_v17 = vshrl.u32 %v389_v9, 30  ;;  %v146_v18 = vshll.u32 %v4049_v33, %v134_v45  ;;  %v147_v19 = vshrl.u32 %v2535_v35, %v135_v58 }
  0x43   :  { %2493 = vsinq.f32 %v312_v63  ;;  %vm320_vm9 = vcmp.eq.s32.totalorder %v2741_v54, 0  ;;  %v96_v21 = vand.u32 2147483647, %v95_v24  ;;  %v136_v1 = vshrl.u32 %v2531_v27, %v135_v58 }
  0x44   :  { %v149_v23 = vshll.u32 %v2535_v35, %v134_v45  ;;  %v150_v26 = vshrl.u32 %v2536_v42, %v135_v58  ;;  %vm319_vm10 = vcmp.lt.s32.totalorder %v2741_v54, 2  ;;  %v391_v28 = vshll.u32 %v2767_v17, 30 }
  0x45   :  { %v139_v41 = vor.u32 %v138_v7, %v137_v61  ;;  %v142_v30 = vor.u32 %v141_v13, %v140_v62  ;;  %v148_v36 = vor.u32 %v147_v19, %v146_v18  ;;  %vm316_vm11 = vweird.f32 %v2562_v0 }
  0x46   :  { %v99_v38 = vmul.f32 %v98_v15, %v96_v21  ;;  %v145_v39 = vor.u32 %v144_v16, %v143_v8  ;;  %v151_v14 = vor.u32 %v150_v26, %v149_v23  ;;  %vm155_vm12 = vcmp.lt.s32.totalorder %v2745_v34, 4 }
  0x47   :  { %vm323_vm13 = vcmp.eq.s32.totalorder %v2741_v54, 2  ;;  %v2780_v40 = vsub.s32 %v388_v60, %v391_v28  ;;  %vm152_vm14 = vcmp.lt.s32.totalorder %v2745_v34, 1  ;;  %vm154_vm15 = vcmp.lt.s32.totalorder %v2745_v34, 3 }
  0x48   :  { %v100_v43 = vxor.u32 2147483648, %v99_v38  ;;  %v2786_v45 = vsel %vm2751_vm8, 0, %v103_v5  ;;  %v157_v46 = vsel %vm155_vm12, %v145_v39, 2102212464  ;;  %v2790_v47 = vshll.u32 %v128_v44, 8 }
  0x49   :  { %v394_v25 = vsub.s32 0, %v2780_v40  ;;  %vm153_vm0 = vcmp.lt.s32.totalorder %v2745_v34, 2  ;;  %v156_v10 = vsel %vm152_vm14, %v136_v1, %v139_v41  ;;  %v161_v11 = vsel %vm155_vm12, %v148_v36, 920167782 }
  0x4a   :  { %v101_v48 = vsel %vm18_vm5, %v100_v43, %v99_v38  ;;  %v160_v49 = vsel %vm152_vm14, %v139_v41, %v142_v30  ;;  %v162_v44 = vsel %vm154_vm15, %v145_v39, %v161_v11  ;;  %v165_v51 = vsel %vm155_vm12, %v151_v14, 1326507024 }
  0x4b   :  { %v104_v58 = vsel %vm2751_vm8, %v2569_v3, %v101_v48  ;;  %v2390_v56 = vmin.u32 %v394_v25, %v2780_v40  ;;  %v158_v57 = vsel %vm154_vm15, %v142_v30, %v157_v46  ;;  %v164_v59 = vsel %vm152_vm14, %v142_v30, %v145_v39 }
  0x4c   :  { %v2806_v53 = vpop.eup %2491  ;;  %2495 = vcosq.f32 %v104_v58  ;;  %v109_v61 = vadd.s32 3, %v2786_v45  ;;  %v166_v62 = vsel %vm154_vm15, %v148_v36, %v165_v51  ;;  %v163_v2 = vsel %vm153_vm0, %v160_v49, %v162_v44  ;;  %v2893_v51 = vld [vmem:[%s4038_s0 + $0x20] sm:$0xff] }
  0x4d   :  { %v2816_v50 = vpop.eup %2493  ;;  %v4040_v60 = vxor.u32 2147483648, %v2806_v53  ;;  %2497 = vsinq.f32 %v104_v58  ;;  %v396_v63 = vclz %v2390_v56  ;;  %v414_v9 = vsub.s32 4, %v2767_v17 }
  0x4e   :  { %v4041_v52 = vxor.u32 2147483648, %v2816_v50  ;;  %v159_v7 = vsel %vm153_vm0, %v156_v10, %v158_v57  ;;  %v167_v13 = vsel %vm153_vm0, %v164_v59, %v166_v62  ;;  %v539_v34 = vand.u32 2139095040, %v2828_v6 }
  0x4f   :  { %v325_v8 = vsel %vm323_vm13, %v4040_v60, %v2816_v50  ;;  %v2391_v15 = vadd.s32 4294967294, %v396_v63  ;;  %v2846_v16 = vmul.u32.u64.low %v2790_v47, %v167_v13  ;;  %v2847_v5 = vmul.u32.u64.high %v2790_v47, %v167_v13, %v2846_v16 }
  0x50   :  { %v322_v24 = vsel %vm320_vm9, %v2806_v53, %v4041_v52  ;;  %v2852_v19 = vmul.u32.u64.low %v2790_v47, %v163_v2  ;;  %v2853_v21 = vmul.u32.u64.high %v2790_v47, %v163_v2, %v2852_v19  ;;  %vm108_vm1 = vweird.f32 %v2569_v3 }
  0x51   :  { %v326_v18 = vsel %vm319_vm10, %v322_v24, %v325_v8  ;;  %vm330_vm2 = vcmp.lt.s32.totalorder %v2574_v4, 0  ;;  %v384_v23 = vadd.s32 %v2727_v37, %v2724_v32  ;;  %vm2392_vm3 = vcmp.lt.s32.totalorder %v2391_v15, 0 }
  0x52   :  { %v2858_v1 = vsel %vm316_vm11, nan, %v326_v18  ;;  %v110_v54 = vand.u32 3, %v109_v61  ;;  %v399_v26 = vsel %vm2392_vm3, 0, %v2391_v15  ;;  %v415_v28 = vsel %vm330_vm2, %v414_v9, %v2767_v17 }
  0x53   :  { %1884 = vrot.lane.b32.xlu1 %v2858_v1, %s2537_s16  ;;  %v540_v41 = vshrl.u32 %v539_v34, 23  ;;  %v400_v30 = vsub.s32 32, %v399_v26  ;;  %v401_v36 = vshll.u32 %v2780_v40, %v399_v26  ;;  %v404_v38 = vsub.s32 4294967266, %v399_v26 }
  0x54   :  { %v175_v39 = vmul.u32 %v2790_v47, %v159_v7  ;;  %vm2873_vm4 = vcmp.le.f32.partialorder %v328_v22, 0.7853982  ;;  %vm177_vm5 = vc.u32 %v2847_v5, %v2852_v19  ;;  %v178_v37 = vadd.s32 1, %v2853_v21 }
  0x55   :  { %v2397_v14 = vadd.s32 4294967169, %v540_v41  ;;  %v402_v43 = vshrl.u32 %v384_v23, %v400_v30  ;;  %v405_v17 = vadd.s32 127, %v404_v38  ;;  %v2881_v46 = vsel %vm2873_vm4, 0, %v415_v28 }
  0x56   :  { %v536_v40 = vand.u32 2147483647, %v2828_v6  ;;  %v2884_v47 = vpop.eup %2495  ;;  %vm112_vm6 = vcmp.eq.s32.totalorder %v110_v54, 0  ;;  %vm115_vm7 = vcmp.eq.s32.totalorder %v110_v54, 2  ;;  %v179_v22 = vsel %vm177_vm5, %v178_v37, %v2853_v21 }
  0x57   :  { %v546_v25 = vadd.s32 1, %v2397_v14  ;;  %v2887_v10 = vpop.eup %2497  ;;  %v4042_v11 = vxor.u32 2147483648, %v2884_v47  ;;  %v403_v48 = vor.u32 %v402_v43, %v401_v36  ;;  %v406_v49 = vshll.u32 %v405_v17, 23 }
  0x58   :  { %v180_v44 = vadd.s32 %v179_v22, %v175_v39  ;;  %vm111_vm8 = vcmp.lt.s32.totalorder %v110_v54, 2  ;;  %v4043_v58 = vxor.u32 2147483648, %v2887_v10  ;;  %v421_v56 = vadd.s32 3, %v2881_v46 }
  0x59   :  { %vm547_vm9 = vcmp.gt.s32.totalorder %v546_v25, 0  ;;  %v117_v57 = vsel %vm115_vm7, %v4042_v11, %v2887_v10  ;;  %v407_v59 = vor.u32 4788187, %v406_v49  ;;  %v410_v61 = vcvt.s32.f32 %v403_v48 }
  0x5a   :  { %v181_v62 = vadd.s32 536870912, %v180_v44  ;;  %v114_v63 = vsel %vm112_vm6, %v2884_v47, %v4043_v58  ;;  %v543_v2 = vand.u32 8388607, %v536_v40  ;;  %v548_v8 = vsel %vm547_vm9, %v546_v25, 0 }
  0x5b   :  { %v435_v9 = vand.u32 2139095040, %v2893_v51  ;;  %v118_v7 = vsel %vm111_vm8, %v114_v63, %v117_v57  ;;  %v408_v13 = vand.u32 2147483647, %v407_v59  ;;  %v550_v16 = vand.u32 31, %v548_v8 }
  0x5c   :  { %v2907_v24 = vshrl.u32 %v181_v62, 30  ;;  %v2911_v15 = vsel %vm108_vm1, nan, %v118_v7  ;;  %v2915_v21 = vand.u32 3, %v421_v56  ;;  %v2918_v34 = vadd.s32 %v2852_v19, %v2847_v5 }
  0x5d   :  { %1880 = vrot.lane.b32.xlu0 %v2911_v15, %s2537_s16  ;;  %v411_v18 = vmul.f32 %v410_v61, %v408_v13  ;;  %v544_v54 = vor.u32 8388608, %v543_v2  ;;  %v551_v26 = vsub.s32 32, %v550_v16  ;;  %v553_v28 = vshll.u32 %v2531_v27, %v550_v16 }
  0x5e   :  { %v183_v23 = vshll.u32 %v2907_v24, 30  ;;  %v436_v41 = vshrl.u32 %v435_v9, 23  ;;  %v556_v38 = vshll.u32 %v2532_v29, %v550_v16  ;;  %v432_v39 = vand.u32 2147483647, %v2893_v51 }
  0x5f   :  { %v412_v30 = vxor.u32 2147483648, %v411_v18  ;;  %v549_v37 = vshrl.u32 %v548_v8, 5  ;;  %v554_v14 = vshrl.u32 %v2532_v29, %v551_v26  ;;  %v557_v5 = vshrl.u32 %v2533_v31, %v551_v26 }
  0x60   :  { %v2922_v36 = vsub.s32 %v180_v44, %v183_v23  ;;  %v559_v19 = vshll.u32 %v2533_v31, %v550_v16  ;;  %v560_v22 = vshrl.u32 %v4049_v33, %v551_v26  ;;  %v562_v25 = vshll.u32 %v4049_v33, %v550_v16 }
  0x61   :  { %v413_v43 = vsel %vm330_vm2, %v412_v30, %v411_v18  ;;  %v552_v49 = vshrl.u32 %v2531_v27, %v551_v26  ;;  %v555_v44 = vor.u32 %v554_v14, %v553_v28  ;;  %v2393_v56 = vadd.s32 4294967169, %v436_v41 }
  0x62   :  { %v186_v17 = vsub.s32 0, %v2922_v36  ;;  %v416_v48 = vsel %vm2873_vm4, %v2574_v4, %v413_v43  ;;  %v558_v59 = vor.u32 %v557_v5, %v556_v38  ;;  %v563_v61 = vshrl.u32 %v2535_v35, %v551_v26 }
  0x63   :  { %2499 = vcosq.f32 %v416_v48  ;;  %v561_v62 = vor.u32 %v560_v22, %v559_v19  ;;  %v565_v63 = vshll.u32 %v2535_v35, %v550_v16  ;;  %v566_v2 = vshrl.u32 %v2536_v42, %v551_v26 }
  0x64   :  { %v2382_v57 = vmin.u32 %v186_v17, %v2922_v36  ;;  %2501 = vsinq.f32 %v416_v48  ;;  %vm122_vm10 = vcmp.lt.s32.totalorder %v2651_v55, 0  ;;  %v564_v8 = vor.u32 %v563_v61, %v562_v25 }
  0x65   :  { %vm568_vm12 = vcmp.lt.s32.totalorder %v549_v37, 1  ;;  %v584_v9 = vshll.u32 %v544_v54, 8  ;;  %v206_v7 = vsub.s32 4, %v2907_v24  ;;  %v567_v13 = vor.u32 %v566_v2, %v565_v63 }
  0x66   :  { %v188_v32 = vclz %v2382_v57  ;;  %vm569_vm13 = vcmp.lt.s32.totalorder %v549_v37, 2  ;;  %v442_v18 = vadd.s32 1, %v2393_v56  ;;  %vm423_vm14 = vcmp.lt.s32.totalorder %v2915_v21, 2 }
  0x67   :  { %vm570_vm15 = vcmp.lt.s32.totalorder %v549_v37, 3  ;;  %vm571_vm0 = vcmp.lt.s32.totalorder %v549_v37, 4  ;;  %v572_v28 = vsel %vm568_vm12, %v552_v49, %v555_v44  ;;  %vm420_vm2 = vweird.f32 %v2574_v4 }
  0x68   :  { %v2383_v23 = vadd.s32 4294967294, %v188_v32  ;;  %v573_v16 = vsel %vm571_vm0, %v561_v62, 2102212464  ;;  %v576_v26 = vsel %vm568_vm12, %v555_v44, %v558_v59  ;;  %v577_v41 = vsel %vm571_vm0, %v564_v8, 920167782 }
  0x69   :  { %v580_v30 = vsel %vm568_vm12, %v558_v59, %v561_v62  ;;  %vm2948_vm3 = vcmp.le.f32.partialorder %v120_v12, 0.7853982  ;;  %v574_v38 = vsel %vm570_vm15, %v558_v59, %v573_v16  ;;  %v578_v14 = vsel %vm570_vm15, %v561_v62, %v577_v41 }
  0x6a   :  { %vm2384_vm4 = vcmp.lt.s32.totalorder %v2383_v23, 0  ;;  %v581_v5 = vsel %vm571_vm0, %v567_v13, 1326507024  ;;  %v575_v43 = vsel %vm569_vm13, %v572_v28, %v574_v38  ;;  %v579_v17 = vsel %vm569_vm13, %v576_v26, %v578_v14 }
  0x6b   :  { %v191_v19 = vsel %vm2384_vm4, 0, %v2383_v23  ;;  %v582_v22 = vsel %vm570_vm15, %v564_v8, %v581_v5  ;;  %v2962_v57 = vmul.u32.u64.low %v584_v9, %v579_v17  ;;  %v2963_v59 = vmul.u32.u64.high %v584_v9, %v579_v17, %v2962_v57 }
  0x6c   :  { %v192_v25 = vsub.s32 32, %v191_v19  ;;  %v193_v48 = vshll.u32 %v2922_v36, %v191_v19  ;;  %v196_v12 = vsub.s32 4294967266, %v191_v19  ;;  %v583_v49 = vsel %vm569_vm13, %v580_v30, %v582_v22 }
  0x6d   :  { %v2959_v44 = vmul.u32.u64.low %v584_v9, %v583_v49  ;;  %v2960_v56 = vmul.u32.u64.high %v584_v9, %v583_v49, %v2959_v44  ;;  %v2966_v61 = vpop.eup %2499  ;;  %vm427_vm5 = vcmp.eq.s32.totalorder %v2915_v21, 2  ;;  %vm443_vm6 = vcmp.gt.s32.totalorder %v442_v18, 0 }
  0x6e   :  { %v194_v62 = vshrl.u32 %v2918_v34, %v192_v25  ;;  %v197_v63 = vadd.s32 127, %v196_v12  ;;  %v2970_v2 = vpop.eup %2501  ;;  %vm424_vm7 = vcmp.eq.s32.totalorder %v2915_v21, 0  ;;  %v4044_v36 = vxor.u32 2147483648, %v2966_v61 }
  0x6f   :  { %v207_v37 = vsel %vm122_vm10, %v206_v7, %v2907_v24  ;;  %v444_v32 = vsel %vm443_vm6, %v442_v18, 0  ;;  %v4045_v8 = vxor.u32 2147483648, %v2970_v2  ;;  %v591_v28 = vmul.u32 %v584_v9, %v575_v43 }
  0x70   :  { %v195_v13 = vor.u32 %v194_v62, %v193_v48  ;;  %v198_v23 = vshll.u32 %v197_v63, 23  ;;  %v429_v34 = vsel %vm427_vm5, %v4044_v36, %v2970_v2  ;;  %vm593_vm8 = vc.u32 %v2960_v56, %v2962_v57 }
  0x71   :  { %v594_v16 = vadd.s32 1, %v2963_v59  ;;  %v439_v26 = vand.u32 8388607, %v432_v39  ;;  %v426_v24 = vsel %vm424_vm7, %v2966_v61, %v4045_v8  ;;  %v446_v41 = vand.u32 31, %v444_v32 }
  0x72   :  { %v199_v7 = vor.u32 4788187, %v198_v23  ;;  %v202_v18 = vcvt.s32.f32 %v195_v13  ;;  %v430_v9 = vsel %vm423_vm14, %v426_v24, %v429_v34  ;;  %v2993_v30 = vsel %vm2948_vm3, 0, %v207_v37 }
  0x73   :  { %v595_v38 = vsel %vm593_vm8, %v594_v16, %v2963_v59  ;;  %v445_v14 = vshrl.u32 %v444_v32, 5  ;;  %v2998_v5 = vsel %vm420_vm2, nan, %v430_v9  ;;  %v447_v17 = vsub.s32 32, %v446_v41 }
  0x74   :  { %v200_v19 = vand.u32 2147483647, %v199_v7  ;;  %v596_v43 = vadd.s32 %v595_v38, %v591_v28  ;;  %1886 = vrot.lane.b32.xlu1 %v2998_v5, %s2537_s16  ;;  %v440_v22 = vor.u32 8388608, %v439_v26  ;;  %v449_v21 = vshll.u32 %v2531_v27, %v446_v41 }
  0x75   :  { %v452_v25 = vshll.u32 %v2532_v29, %v446_v41  ;;  %v213_v12 = vadd.s32 3, %v2993_v30  ;;  %v450_v44 = vshrl.u32 %v2532_v29, %v447_v17  ;;  %v453_v59 = vshrl.u32 %v2533_v31, %v447_v17 }
  0x76   :  { %v203_v48 = vmul.f32 %v202_v18, %v200_v19  ;;  %v597_v49 = vadd.s32 536870912, %v596_v43  ;;  %v455_v62 = vshll.u32 %v2533_v31, %v446_v41  ;;  %v456_v63 = vshrl.u32 %v4049_v33, %v447_v17 }
  0x77   :  { %v458_v37 = vshll.u32 %v4049_v33, %v446_v41  ;;  %v459_v23 = vshrl.u32 %v2535_v35, %v447_v17  ;;  %vm464_vm9 = vcmp.lt.s32.totalorder %v445_v14, 1  ;;  %v451_v28 = vor.u32 %v450_v44, %v449_v21 }
  0x78   :  { %v204_v32 = vxor.u32 2147483648, %v203_v48  ;;  %v598_v13 = vshrl.u32 %v597_v49, 30  ;;  %v454_v34 = vor.u32 %v453_v59, %v452_v25  ;;  %v461_v16 = vshll.u32 %v2535_v35, %v446_v41 }
  0x79   :  { %v462_v26 = vshrl.u32 %v2536_v42, %v447_v17  ;;  %v448_v18 = vshrl.u32 %v2531_v27, %v447_v17  ;;  %v460_v9 = vor.u32 %v459_v23, %v458_v37  ;;  %v457_v19 = vor.u32 %v456_v63, %v455_v62 }
  0x7a   :  { %v205_v24 = vsel %vm122_vm10, %v204_v32, %v203_v48  ;;  %v599_v7 = vshll.u32 %v598_v13, 30  ;;  %vm467_vm12 = vcmp.lt.s32.totalorder %v445_v14, 4  ;;  %vm466_vm13 = vcmp.lt.s32.totalorder %v445_v14, 3 }
  0x7b   :  { %v208_v38 = vsel %vm2948_vm3, %v2651_v55, %v205_v24  ;;  %v463_v49 = vor.u32 %v462_v26, %v461_v16  ;;  %v480_v41 = vshll.u32 %v440_v22, 8  ;;  %vm465_vm14 = vcmp.lt.s32.totalorder %v445_v14, 2 }
  0x7c   :  { %2503 = vcosq.f32 %v208_v38  ;;  %v3019_v21 = vsub.s32 %v596_v43, %v599_v7  ;;  %v469_v25 = vsel %vm467_vm12, %v457_v19, 2102212464  ;;  %v472_v48 = vsel %vm464_vm9, %v451_v28, %v454_v34 }
  0x7d   :  { %2505 = vsinq.f32 %v208_v38  ;;  %v214_v17 = vand.u32 3, %v213_v12  ;;  %v622_v59 = vsub.s32 4, %v598_v13  ;;  %v473_v54 = vsel %vm467_vm12, %v460_v9, 920167782 }
  0x7e   :  { %v602_v44 = vsub.s32 0, %v3019_v21  ;;  %v468_v62 = vsel %vm464_vm9, %v448_v18, %v451_v28  ;;  %v474_v63 = vsel %vm466_vm13, %v457_v19, %v473_v54  ;;  %v476_v43 = vsel %vm464_vm9, %v454_v34, %v457_v19  ;;  %v3040_v28 = vld [vmem:[%s4038_s0 + $0x38] sm:$0xff]  ;;  %v3069_v54 = vld [vmem:[%s4038_s0 + $0x30] sm:$0xff] }
  0x7f   :  { %v477_v22 = vsel %vm467_vm12, %v463_v49, 1326507024  ;;  %v470_v32 = vsel %vm466_vm13, %v454_v34, %v469_v25  ;;  %v475_v23 = vsel %vm465_vm14, %v472_v48, %v474_v63  ;;  %vm212_vm10 = vweird.f32 %v2651_v55 }
  0x80   :  { %v2398_v37 = vmin.u32 %v602_v44, %v3019_v21  ;;  %v478_v12 = vsel %vm466_vm13, %v460_v9, %v477_v22  ;;  %v3034_v26 = vmul.u32.u64.low %v480_v41, %v475_v23  ;;  %v3035_v24 = vmul.u32.u64.high %v480_v41, %v475_v23, %v3034_v26 }
  0x81   :  { %v479_v16 = vsel %vm465_vm14, %v476_v43, %v478_v12  ;;  %vm538_vm15 = vcmp.lt.s32.totalorder %v2828_v6, 0  ;;  %v471_v18 = vsel %vm465_vm14, %v468_v62, %v470_v32  ;;  %vm215_vm0 = vcmp.lt.s32.totalorder %v214_v17, 2 }
  0x82   :  { %v604_v7 = vclz %v2398_v37  ;;  %v623_v34 = vsel %vm538_vm15, %v622_v59, %v598_v13  ;;  %v3047_v9 = vmul.u32.u64.low %v480_v41, %v479_v16  ;;  %v3048_v38 = vmul.u32.u64.high %v480_v41, %v479_v16, %v3047_v9 }
  0x83   :  { %vm3052_vm3 = vcmp.le.f32.partialorder %v536_v40, 0.7853982  ;;  %v747_v25 = vand.u32 2139095040, %v3040_v28  ;;  %vm216_vm4 = vcmp.eq.s32.totalorder %v214_v17, 0  ;;  %vm219_vm5 = vcmp.eq.s32.totalorder %v214_v17, 2 }
  0x84   :  { %v2399_v49 = vadd.s32 4294967294, %v604_v7  ;;  %v592_v13 = vadd.s32 %v2962_v57, %v2960_v56  ;;  %v490_v14 = vadd.s32 1, %v3035_v24  ;;  %v3064_v44 = vsel %vm3052_vm3, 0, %v623_v34 }
  0x85   :  { %v487_v40 = vmul.u32 %v480_v41, %v471_v18  ;;  %v748_v59 = vshrl.u32 %v747_v25, 23  ;;  %vm489_vm7 = vc.u32 %v3048_v38, %v3034_v26  ;;  %v4046_v63 = vand.u32 2147483647, %v3040_v28 }
  0x86   :  { %v3060_v48 = vpop.eup %2503  ;;  %vm2400_vm6 = vcmp.lt.s32.totalorder %v2399_v49, 0  ;;  %v491_v23 = vsel %vm489_vm7, %v490_v14, %v3035_v24  ;;  %v643_v16 = vand.u32 2139095040, %v3069_v54 }
  0x87   :  { %v3071_v62 = vpop.eup %2505  ;;  %v4047_v56 = vxor.u32 2147483648, %v3060_v48  ;;  %v607_v57 = vsel %vm2400_vm6, 0, %v2399_v49  ;;  %v2405_v12 = vadd.s32 4294967169, %v748_v59  ;;  %v492_v9 = vadd.s32 %v491_v23, %v487_v40 }
  0x88   :  { %v4048_v43 = vxor.u32 2147483648, %v3071_v62  ;;  %v608_v22 = vsub.s32 32, %v607_v57  ;;  %v609_v41 = vshll.u32 %v3019_v21, %v607_v57  ;;  %v612_v37 = vsub.s32 4294967266, %v607_v57 }
  0x89   :  { %v221_v32 = vsel %vm219_vm5, %v4047_v56, %v3071_v62  ;;  %v629_v49 = vadd.s32 3, %v3064_v44  ;;  %v754_v25 = vadd.s32 1, %v2405_v12  ;;  %v493_v59 = vadd.s32 536870912, %v492_v9 }
  0x8a   :  { %v218_v7 = vsel %vm216_vm4, %v3060_v48, %v4048_v43  ;;  %v610_v34 = vshrl.u32 %v592_v13, %v608_v22  ;;  %v613_v18 = vadd.s32 127, %v612_v37  ;;  %v751_v13 = vand.u32 8388607, %v4046_v63 }
  0x8b   :  { %v222_v21 = vsel %vm215_vm0, %v218_v7, %v221_v32  ;;  %vm755_vm8 = vcmp.gt.s32.totalorder %v754_v25, 0  ;;  %v644_v40 = vshrl.u32 %v643_v16, 23  ;;  %v3098_v37 = vshrl.u32 %v493_v59, 30 }
  0x8c   :  { %v3092_v57 = vsel %vm212_vm10, nan, %v222_v21  ;;  %v611_v24 = vor.u32 %v610_v34, %v609_v41  ;;  %v614_v14 = vshll.u32 %v613_v18, 23  ;;  %v756_v32 = vsel %vm755_vm8, %v754_v25, 0 }
  0x8d   :  { %1882 = vrot.lane.b32.xlu0 %v3092_v57, %s2537_s16  ;;  %v758_v23 = vand.u32 31, %v756_v32  ;;  %v3100_v7 = vand.u32 3, %v629_v49  ;;  %v495_v41 = vshll.u32 %v3098_v37, 30  ;;  %v488_v34 = vadd.s32 %v3034_v26, %v3048_v38 }
  0x8e   :  { %v615_v17 = vor.u32 4788187, %v614_v14  ;;  %v618_v22 = vcvt.s32.f32 %v611_v24  ;;  %v752_v18 = vor.u32 8388608, %v751_v13  ;;  %v2401_v60 = vadd.s32 4294967169, %v644_v40 }
  0x8f   :  { %v759_v21 = vsub.s32 32, %v758_v23  ;;  %v3104_v11 = vsub.s32 %v492_v9, %v495_v41  ;;  %v761_v16 = vshll.u32 %v2531_v27, %v758_v23  ;;  %v764_v24 = vshll.u32 %v2532_v29, %v758_v23 }
  0x90   :  { %v616_v12 = vand.u32 2147483647, %v615_v17  ;;  %v767_v49 = vshll.u32 %v2533_v31, %v758_v23  ;;  %v770_v59 = vshll.u32 %v4049_v33, %v758_v23  ;;  %v757_v38 = vshrl.u32 %v756_v32, 5 }
  0x91   :  { %v762_v25 = vshrl.u32 %v2532_v29, %v759_v21  ;;  %v765_v14 = vshrl.u32 %v2533_v31, %v759_v21  ;;  %v498_v26 = vsub.s32 0, %v3104_v11  ;;  %v768_v13 = vshrl.u32 %v4049_v33, %v759_v21 }
  0x92   :  { %v619_v52 = vmul.f32 %v618_v22, %v616_v12  ;;  %v760_v9 = vshrl.u32 %v2531_v27, %v759_v21  ;;  %v771_v40 = vshrl.u32 %v2535_v35, %v759_v21  ;;  %v773_v22 = vshll.u32 %v2535_v35, %v758_v23 }
  0x93   :  { %v3117_v12 = vshll.u32 %v752_v18, 8  ;;  %v2394_v58 = vmin.u32 %v498_v26, %v3104_v11  ;;  %v763_v36 = vor.u32 %v762_v25, %v761_v16  ;;  %v766_v8 = vor.u32 %v765_v14, %v764_v24 }
  0x94   :  { %v620_v17 = vxor.u32 2147483648, %v619_v52  ;;  %v769_v63 = vor.u32 %v768_v13, %v767_v49  ;;  %v772_v56 = vor.u32 %v771_v40, %v770_v59  ;;  %v774_v43 = vshrl.u32 %v2536_v42, %v759_v21 }
  0x95   :  { %v500_v33 = vclz %v2394_v58  ;;  %vm776_vm9 = vcmp.lt.s32.totalorder %v757_v38, 1  ;;  %v650_v23 = vadd.s32 1, %v2401_v60  ;;  %v518_v18 = vsub.s32 4, %v3098_v37 }
  0x96   :  { %v621_v41 = vsel %vm538_vm15, %v620_v17, %v619_v52  ;;  %v775_v52 = vor.u32 %v774_v43, %v773_v22  ;;  %vm777_vm12 = vcmp.lt.s32.totalorder %v757_v38, 2  ;;  %vm778_vm13 = vcmp.lt.s32.totalorder %v757_v38, 3 }
  0x97   :  { %v624_v32 = vsel %vm3052_vm3, %v2828_v6, %v621_v41  ;;  %v2395_v17 = vadd.s32 4294967294, %v500_v33  ;;  %vm779_vm14 = vcmp.lt.s32.totalorder %v757_v38, 4  ;;  %v780_v16 = vsel %vm776_vm9, %v760_v9, %v763_v36 }
  0x98   :  { %2507 = vcosq.f32 %v624_v32  ;;  %v781_v24 = vsel %vm779_vm14, %v769_v63, 2102212464  ;;  %v784_v19 = vsel %vm776_vm9, %v763_v36, %v766_v8  ;;  %v785_v25 = vsel %vm779_vm14, %v772_v56, 920167782 }
  0x99   :  { %2509 = vsinq.f32 %v624_v32  ;;  %v788_v14 = vsel %vm776_vm9, %v766_v8, %v769_v63  ;;  %vm2396_vm15 = vcmp.lt.s32.totalorder %v2395_v17, 0  ;;  %v782_v49 = vsel %vm778_vm13, %v766_v8, %v781_v24 }
  0x9a   :  { %v786_v21 = vsel %vm778_vm13, %v769_v63, %v785_v25  ;;  %v789_v59 = vsel %vm779_vm14, %v775_v52, 1326507024  ;;  %v503_v58 = vsel %vm2396_vm15, 0, %v2395_v17  ;;  %v783_v60 = vsel %vm777_vm12, %v780_v16, %v782_v49 }
  0x9b   :  { %v787_v26 = vsel %vm777_vm12, %v784_v19, %v786_v21  ;;  %v790_v13 = vsel %vm778_vm13, %v772_v56, %v789_v59  ;;  %v504_v43 = vsub.s32 32, %v503_v58  ;;  %v505_v33 = vshll.u32 %v3104_v11, %v503_v58 }
  0x9c   :  { %v508_v40 = vsub.s32 4294967266, %v503_v58  ;;  %v791_v9 = vsel %vm777_vm12, %v788_v14, %v790_v13  ;;  %v3136_v8 = vmul.u32.u64.low %v3117_v12, %v787_v26  ;;  %v3137_v63 = vmul.u32.u64.high %v3117_v12, %v787_v26, %v3136_v8 }
  0x9d   :  { %v3132_v36 = vmul.u32.u64.low %v3117_v12, %v791_v9  ;;  %v3133_v22 = vmul.u32.u64.high %v3117_v12, %v791_v9, %v3132_v36  ;;  %vm628_vm0 = vweird.f32 %v2828_v6  ;;  %vm434_vm3 = vcmp.lt.s32.totalorder %v2893_v51, 0 }
  0x9e   :  { %v506_v56 = vshrl.u32 %v488_v34, %v504_v43  ;;  %v509_v41 = vadd.s32 127, %v508_v40  ;;  %vm632_vm4 = vcmp.eq.s32.totalorder %v3100_v7, 0  ;;  %vm635_vm5 = vcmp.eq.s32.totalorder %v3100_v7, 2 }
  0x9f   :  { %v640_v11 = vand.u32 2147483647, %v3069_v54  ;;  %vm651_vm6 = vcmp.gt.s32.totalorder %v650_v23, 0  ;;  %v799_v17 = vmul.u32 %v3117_v12, %v783_v60  ;;  %v519_v34 = vsel %vm434_vm3, %v518_v18, %v3098_v37 }
  0xa0   :  { %v507_v32 = vor.u32 %v506_v56, %v505_v33  ;;  %v510_v52 = vshll.u32 %v509_v41, 23  ;;  %v652_v16 = vsel %vm651_vm6, %v650_v23, 0  ;;  %vm801_vm7 = vc.u32 %v3133_v22, %v3136_v8 }
  0xa1   :  { %v802_v25 = vadd.s32 1, %v3137_v63  ;;  %vm631_vm8 = vcmp.lt.s32.totalorder %v3100_v7, 2  ;;  %vm3166_vm9 = vcmp.le.f32.partialorder %v432_v39, 0.7853982  ;;  %v654_v21 = vand.u32 31, %v652_v16 }
  0xa2   :  { %v3145_v38 = vpop.eup %2507  ;;  %v511_v49 = vor.u32 4788187, %v510_v52  ;;  %v514_v12 = vcvt.s32.f32 %v507_v32  ;;  %v3178_v60 = vsel %vm3166_vm9, 0, %v519_v34  ;;  %v647_v39 = vand.u32 8388607, %v640_v11 }
  0xa3   :  { %v3148_v24 = vpop.eup %2509  ;;  %v636_v19 = vxor.u32 2147483648, %v3145_v38  ;;  %v803_v18 = vsel %vm801_vm7, %v802_v25, %v3137_v63  ;;  %v653_v43 = vshrl.u32 %v652_v16, 5  ;;  %v655_v33 = vsub.s32 32, %v654_v21 }
  0xa4   :  { %v633_v14 = vxor.u32 2147483648, %v3148_v24  ;;  %v512_v58 = vand.u32 2147483647, %v511_v49  ;;  %v804_v26 = vadd.s32 %v803_v18, %v799_v17  ;;  %v657_v7 = vshll.u32 %v2531_v27, %v654_v21 }
  0xa5   :  { %v637_v23 = vsel %vm635_vm5, %v636_v19, %v3148_v24  ;;  %v525_v63 = vadd.s32 3, %v3178_v60  ;;  %v658_v56 = vshrl.u32 %v2532_v29, %v655_v33  ;;  %v660_v41 = vshll.u32 %v2532_v29, %v654_v21 }
  0xa6   :  { %v634_v59 = vsel %vm632_vm4, %v3145_v38, %v633_v14  ;;  %v515_v9 = vmul.f32 %v514_v12, %v512_v58  ;;  %v805_v36 = vadd.s32 536870912, %v804_v26  ;;  %v663_v32 = vshll.u32 %v2533_v31, %v654_v21 }
  0xa7   :  { %v638_v13 = vsel %vm631_vm8, %v634_v59, %v637_v23  ;;  %v661_v16 = vshrl.u32 %v2533_v31, %v655_v33  ;;  %v4063_v34 = vmov 2102212464   ;;  %v648_v49 = vor.u32 8388608, %v647_v39 }
  0xa8   :  { %v3184_v40 = vsel %vm628_vm0, nan, %v638_v13  ;;  %v516_v52 = vxor.u32 2147483648, %v515_v9  ;;  %v3193_v17 = vshrl.u32 %v805_v36, 30  ;;  %v664_v25 = vshrl.u32 %v4063_v34, %v655_v33 }
  0xa9   :  { %1890 = vrot.lane.b32.xlu1 %v3184_v40, %s2537_s16  ;;  %v666_v12 = vshll.u32 %v4063_v34, %v654_v21  ;;  %v667_v23 = vshrl.u32 %v2535_v35, %v655_v33  ;;  %v669_v18 = vshll.u32 %v2535_v35, %v654_v21  ;;  %v659_v58 = vor.u32 %v658_v56, %v657_v7 }
  0xaa   :  { %v517_v59 = vsel %vm434_vm3, %v516_v52, %v515_v9  ;;  %v807_v29 = vshll.u32 %v3193_v17, 30  ;;  %vm672_vm12 = vcmp.lt.s32.totalorder %v653_v43, 1  ;;  %v662_v13 = vor.u32 %v661_v16, %v660_v41 }
  0xab   :  { %v520_v31 = vsel %vm3166_vm9, %v2893_v51, %v517_v59  ;;  %v668_v36 = vor.u32 %v667_v23, %v666_v12  ;;  %v670_v39 = vshrl.u32 %v2536_v42, %v655_v33  ;;  %v656_v35 = vshrl.u32 %v2531_v27, %v655_v33 }
  0xac   :  { %2511 = vcosq.f32 %v520_v31  ;;  %v3207_v34 = vsub.s32 %v804_v26, %v807_v29  ;;  %v665_v21 = vor.u32 %v664_v25, %v663_v32  ;;  %vm674_vm13 = vcmp.lt.s32.totalorder %v653_v43, 3 }
  0xad   :  { %2513 = vsinq.f32 %v520_v31  ;;  %v671_v9 = vor.u32 %v670_v39, %v669_v18  ;;  %v1044_v7 = vand.u32 3, %v2993_v30  ;;  %v526_v56 = vand.u32 3, %v525_v63 }
  0xae   :  { %v810_v52 = vsub.s32 0, %v3207_v34  ;;  %vm673_vm14 = vcmp.lt.s32.totalorder %v653_v43, 2  ;;  %vm675_vm15 = vcmp.lt.s32.totalorder %v653_v43, 4  ;;  %v680_v41 = vsel %vm672_vm12, %v659_v58, %v662_v13 }
  0xaf   :  { %v677_v37 = vsel %vm675_vm15, %v665_v21, 2102212464  ;;  %v681_v42 = vsel %vm675_vm15, %v668_v36, 920167782  ;;  %v688_v16 = vshll.u32 %v648_v49, 8  ;;  %v676_v27 = vsel %vm672_vm12, %v656_v35, %v659_v58 }
  0xb0   :  { %v2406_v26 = vmin.u32 %v810_v52, %v3207_v34  ;;  %v678_v33 = vsel %vm674_vm13, %v662_v13, %v677_v37  ;;  %v682_v32 = vsel %vm674_vm13, %v665_v21, %v681_v42  ;;  %v684_v63 = vsel %vm672_vm12, %v662_v13, %v665_v21 }
  0xb1   :  { %v683_v30 = vsel %vm673_vm14, %v680_v41, %v682_v32  ;;  %v685_v25 = vsel %vm675_vm15, %v671_v9, 1326507024  ;;  %vm1046_vm3 = vcmp.eq.s32.totalorder %v1044_v7, 0  ;;  %vm527_vm4 = vcmp.lt.s32.totalorder %v526_v56, 2 }
  0xb2   :  { %vm528_vm5 = vcmp.eq.s32.totalorder %v526_v56, 0  ;;  %v812_v12 = vclz %v2406_v26  ;;  %vm1045_vm6 = vcmp.lt.s32.totalorder %v1044_v7, 2  ;;  %v679_v49 = vsel %vm673_vm14, %v676_v27, %v678_v33 }
  0xb3   :  { %v686_v23 = vsel %vm674_vm13, %v668_v36, %v685_v25  ;;  %v3221_v18 = vmul.u32.u64.low %v688_v16, %v683_v30  ;;  %v3222_v59 = vmul.u32.u64.high %v688_v16, %v683_v30, %v3221_v18  ;;  %v4064_v31 = vxor.u32 2147483648, %v3071_v62 }
  0xb4   :  { %v2407_v29 = vadd.s32 4294967294, %v812_v12  ;;  %v687_v58 = vsel %vm673_vm14, %v684_v63, %v686_v23  ;;  %vm1049_vm7 = vcmp.eq.s32.totalorder %v1044_v7, 2  ;;  %vm531_vm8 = vcmp.eq.s32.totalorder %v526_v56, 2 }
  0xb5   :  { %v1048_v13 = vsel %vm1046_vm3, %v3060_v48, %v4064_v31  ;;  %v3229_v39 = vmul.u32.u64.low %v688_v16, %v687_v58  ;;  %v3230_v35 = vmul.u32.u64.high %v688_v16, %v687_v58, %v3229_v39  ;;  %v4065_v21 = vxor.u32 2147483648, %v3060_v48 }
  0xb6   :  { %v3235_v9 = vpop.eup %2511  ;;  %v800_v52 = vadd.s32 %v3136_v8, %v3133_v22  ;;  %vm2408_vm9 = vcmp.lt.s32.totalorder %v2407_v29, 0  ;;  %v695_v43 = vmul.u32 %v688_v16, %v679_v49  ;;  %v698_v27 = vadd.s32 1, %v3222_v59 }
  0xb7   :  { %v1051_v36 = vsel %vm1049_vm7, %v4065_v21, %v3071_v62  ;;  %v3240_v41 = vpop.eup %2513  ;;  %v532_v42 = vxor.u32 2147483648, %v3235_v9  ;;  %v815_v26 = vsel %vm2408_vm9, 0, %v2407_v29  ;;  %vm524_vm12 = vweird.f32 %v2893_v51 }
  0xb8   :  { %v1052_v37 = vsel %vm1045_vm6, %v1048_v13, %v1051_v36  ;;  %v529_v62 = vxor.u32 2147483648, %v3240_v41  ;;  %v816_v33 = vsub.s32 32, %v815_v26  ;;  %v817_v22 = vshll.u32 %v3207_v34, %v815_v26 }
  0xb9   :  { %v3246_v48 = vsel %vm212_vm10, nan, %v1052_v37  ;;  %v820_v8 = vsub.s32 4294967266, %v815_v26  ;;  %v533_v7 = vsel %vm531_vm8, %v532_v42, %v3240_v41  ;;  %vm697_vm13 = vc.u32 %v3230_v35, %v3221_v18 }
  0xba   :  { %v530_v55 = vsel %vm528_vm5, %v3235_v9, %v529_v62  ;;  %v818_v16 = vshrl.u32 %v800_v52, %v816_v33  ;;  %v699_v30 = vsel %vm697_vm13, %v698_v27, %v3222_v59  ;;  %v830_v31 = vsub.s32 4, %v3193_v17 }
  0xbb   :  { %v821_v32 = vadd.s32 127, %v820_v8  ;;  %v534_v34 = vsel %vm527_vm4, %v530_v55, %v533_v7  ;;  %v700_v63 = vadd.s32 %v699_v30, %v695_v43  ;;  %vm746_vm10 = vcmp.lt.s32.totalorder %v3040_v28, 0 }
  0xbc   :  { %v535_v25 = vsel %vm524_vm12, nan, %v534_v34  ;;  %v819_v12 = vor.u32 %v818_v16, %v817_v22  ;;  %v1456_v59 = vand.u32 3, %v3064_v44  ;;  %v831_v36 = vsel %vm746_vm10, %v830_v31, %v3193_v17 }
  0xbd   :  { %v822_v49 = vshll.u32 %v821_v32, 23  ;;  %1888 = vrot.lane.b32.xlu0 %v535_v25, %s2537_s16  ;;  %v701_v23 = vadd.s32 536870912, %v700_v63  ;;  %v4066_v43 = vand.u32 2147483647, %v3040_v28  ;;  %v1353_v55 = vand.u32 3, %v3178_v60 }
  0xbe   :  { %v826_v58 = vcvt.s32.f32 %v819_v12  ;;  %vm1458_vm15 = vcmp.eq.s32.totalorder %v1456_v59, 0  ;;  %vm1461_vm3 = vcmp.eq.s32.totalorder %v1456_v59, 2  ;;  %vm1457_vm4 = vcmp.lt.s32.totalorder %v1456_v59, 2 }
  0xbf   :  { %v823_v29 = vor.u32 4788187, %v822_v49  ;;  %v3265_v13 = vshrl.u32 %v701_v23, 30  ;;  %vm745_vm14 = vcmp.le.f32.partialorder %v4066_v43, 0.7853982  ;;  %v1460_v22 = vsel %vm1458_vm15, %v3145_v38, %v633_v14 }
  0xc0   :  { %v3273_v26 = vsel %vm745_vm14, 0, %v831_v36  ;;  %v1463_v7 = vsel %vm1461_vm3, %v636_v19, %v3148_v24  ;;  %v1673_v32 = vmul.f32 2.0, %v3092_v57  ;;  %vm1354_vm5 = vcmp.lt.s32.totalorder %v1353_v55, 2 }
  0xc1   :  { %v824_v39 = vand.u32 2147483647, %v823_v29  ;;  %v703_v56 = vshll.u32 %v3265_v13, 30  ;;  %v837_v17 = vadd.s32 3, %v3273_v26  ;;  %v1464_v30 = vsel %vm1457_vm4, %v1460_v22, %v1463_v7 }
  0xc2   :  { %vm1355_vm6 = vcmp.eq.s32.totalorder %v1353_v55, 0  ;;  %v1697_v14 = vmul.f32 %v3092_v57, %v3092_v57  ;;  %vm1358_vm7 = vcmp.eq.s32.totalorder %v1353_v55, 2  ;;  %v1677_v12 = vmul.f32 2.0, %v3184_v40 }
  0xc3   :  { %v827_v21 = vmul.f32 %v826_v58, %v824_v39  ;;  %v704_v52 = vsub.s32 %v700_v63, %v703_v56  ;;  %v1357_v63 = vsel %vm1355_vm6, %v3235_v9, %v529_v62  ;;  %v838_v38 = vand.u32 3, %v837_v17 }
  0xc4   :  { %v1250_v24 = vand.u32 3, %v2881_v46  ;;  %v1360_v19 = vsel %vm1358_vm7, %v532_v42, %v3240_v41  ;;  %vm836_vm8 = vweird.f32 %v3040_v28  ;;  %v696_v60 = vadd.s32 %v3221_v18, %v3230_v35 }
  0xc5   :  { %v828_v37 = vxor.u32 2147483648, %v827_v21  ;;  %v706_v27 = vsub.s32 0, %v704_v52  ;;  %v1689_v57 = vmul.f32 %v3246_v48, %v3246_v48  ;;  %v1361_v62 = vsel %vm1354_vm5, %v1357_v63, %v1360_v19 }
  0xc6   :  { %v1676_v49 = vmul.f32 2.0, %v535_v25  ;;  %v3300_v29 = vsel %vm628_vm0, nan, %v1464_v30  ;;  %v3303_v46 = vmul.f32 %v1673_v32, %v3246_v48  ;;  %v3307_v18 = vsel %vm524_vm12, nan, %v1361_v62 }
  0xc7   :  { %v829_v33 = vsel %vm746_vm10, %v828_v37, %v827_v21  ;;  %v2402_v8 = vmin.u32 %v706_v27, %v704_v52  ;;  %v1701_v35 = vmul.f32 %v3184_v40, %v3184_v40  ;;  %v1700_v58 = vmul.f32 %v535_v25, %v535_v25 }
  0xc8   :  { %v832_v44 = vsel %vm745_vm14, %v3040_v28, %v829_v33  ;;  %v1693_v31 = vmul.f32 %v3300_v29, %v3300_v29  ;;  %v1692_v6 = vmul.f32 %v3307_v18, %v3307_v18  ;;  %vm839_vm0 = vcmp.lt.s32.totalorder %v838_v38, 2 }
  0xc9   :  { %2515 = vcosq.f32 %v832_v44  ;;  %v708_v16 = vclz %v2402_v8  ;;  %v3316_v59 = vmul.f32 %v1677_v12, %v3300_v29  ;;  %vm840_vm13 = vcmp.eq.s32.totalorder %v838_v38, 0 }
  0xca   :  { %2517 = vsinq.f32 %v832_v44  ;;  %vm843_vm12 = vcmp.eq.s32.totalorder %v838_v38, 2  ;;  %v3319_v51 = vmul.f32 %v1676_v49, %v3307_v18  ;;  %v3321_v40 = vsub.f32 %v1689_v57, %v1697_v14 }
  0xcb   :  { %v2403_v34 = vadd.s32 4294967294, %v708_v16  ;;  %vm1252_vm10 = vcmp.eq.s32.totalorder %v1250_v24, 0  ;;  %v3323_v27 = vsub.f32 %v1693_v31, %v1701_v35  ;;  %v3325_v33 = vsub.f32 %v1692_v6, %v1700_v58 }
  0xcc   :  { %v1713_v22 = vmul.f32 2.0, %v3303_v46  ;;  %vm1255_vm14 = vcmp.eq.s32.totalorder %v1250_v24, 2  ;;  %v726_v30 = vsub.s32 4, %v3265_v13  ;;  %vm1251_vm15 = vcmp.lt.s32.totalorder %v1250_v24, 2 }
  0xcd   :  { %vm2404_vm9 = vcmp.lt.s32.totalorder %v2403_v34, 0  ;;  %v4068_v12 = vxor.u32 2147483648, %v2966_v61  ;;  %v1662_v38 = vand.u32 3, %v3273_v26  ;;  %vm3350_vm3 = vcmp.le.f32.partialorder %v640_v11, 0.7853982 }
  0xce   :  { %v711_v23 = vsel %vm2404_vm9, 0, %v2403_v34  ;;  %v3330_v55 = vmul.f32 %v1713_v22, %v3321_v40  ;;  %v4067_v34 = vxor.u32 2147483648, %v2970_v2  ;;  %vm642_vm4 = vcmp.lt.s32.totalorder %v3069_v54, 0 }
  0xcf   :  { %v712_v9 = vsub.s32 32, %v711_v23  ;;  %v713_v41 = vshll.u32 %v704_v52, %v711_v23  ;;  %v716_v42 = vsub.s32 4294967266, %v711_v23  ;;  %v1257_v19 = vsel %vm1255_vm14, %v4068_v12, %v2970_v2 }
  0xd0   :  { %v1254_v63 = vsel %vm1252_vm10, %v2966_v61, %v4067_v34  ;;  %v1717_v24 = vmul.f32 2.0, %v3316_v59  ;;  %v1716_v62 = vmul.f32 2.0, %v3319_v51  ;;  %v727_v2 = vsel %vm642_vm4, %v726_v30, %v3265_v13 }
  0xd1   :  { %v714_v39 = vshrl.u32 %v696_v60, %v712_v9  ;;  %v717_v56 = vadd.s32 127, %v716_v42  ;;  %v1258_v26 = vsel %vm1251_vm15, %v1254_v63, %v1257_v19  ;;  %v1729_v49 = vmul.f32 %v3321_v40, %v3321_v40 }
  0xd2   :  { %vm1667_vm5 = vcmp.eq.s32.totalorder %v1662_v38, 2  ;;  %v3361_v23 = vmul.f32 %v1717_v24, %v3323_v27  ;;  %v3364_v11 = vmul.f32 %v1716_v62, %v3325_v33  ;;  %v1737_v9 = vmul.f32 %v3303_v46, %v3303_v46 }
  0xd3   :  { %v2516_v21 = vpop.eup %2515  ;;  %v715_v52 = vor.u32 %v714_v39, %v713_v41  ;;  %v718_v43 = vshll.u32 %v717_v56, 23  ;;  %vm1664_vm6 = vcmp.eq.s32.totalorder %v1662_v38, 0  ;;  %v3375_v42 = vsel %vm3350_vm3, 0, %v727_v2 }
  0xd4   :  { %v2518_v25 = vpop.eup %2517  ;;  %v844_v36 = vxor.u32 2147483648, %v2516_v21  ;;  %v3379_v35 = vsel %vm420_vm2, nan, %v1258_v26  ;;  %v3381_v58 = vsub.f32 %v1729_v49, %v1737_v9  ;;  %vm1663_vm7 = vcmp.lt.s32.totalorder %v1662_v38, 2 }
  0xd5   :  { %v841_v37 = vxor.u32 2147483648, %v2518_v25  ;;  %v719_v8 = vor.u32 4788187, %v718_v43  ;;  %v722_v17 = vcvt.s32.f32 %v715_v52  ;;  %v1733_v6 = vmul.f32 %v3323_v27, %v3323_v27 }
  0xd6   :  { %v845_v44 = vsel %vm843_vm12, %v844_v36, %v2518_v25  ;;  %v1669_v31 = vsel %vm1667_vm5, %v844_v36, %v2518_v25  ;;  %v1741_v39 = vmul.f32 %v3316_v59, %v3316_v59  ;;  %v733_v56 = vadd.s32 3, %v3375_v42 }
  0xd7   :  { %v842_v7 = vsel %vm840_vm13, %v2516_v21, %v841_v37  ;;  %v720_v32 = vand.u32 2147483647, %v719_v8  ;;  %v941_v52 = vand.u32 3, %v2786_v45  ;;  %v1732_v4 = vmul.f32 %v3325_v33, %v3325_v33 }
  0xd8   :  { %v846_v16 = vsel %vm839_vm0, %v842_v7, %v845_v44  ;;  %v1740_v25 = vmul.f32 %v3319_v51, %v3319_v51  ;;  %v1753_v36 = vmul.f32 2.0, %v3330_v55  ;;  %v1757_v22 = vmul.f32 2.0, %v3361_v23 }
  0xd9   :  { %v3336_v14 = vsel %vm836_vm8, nan, %v846_v16  ;;  %v723_v60 = vmul.f32 %v722_v17, %v720_v32  ;;  %v1756_v44 = vmul.f32 2.0, %v3364_v11  ;;  %v734_v8 = vand.u32 3, %v733_v56 }
  0xda   :  { %1894 = vrot.lane.b32.xlu1 %v3336_v14, %s2537_s16  ;;  %v3402_v45 = vmul.f32 %v1753_v36, %v3381_v58  ;;  %vm943_vm2 = vcmp.eq.s32.totalorder %v941_v52, 0  ;;  %vm946_vm9 = vcmp.eq.s32.totalorder %v941_v52, 2  ;;  %v1769_v32 = vmul.f32 %v3381_v58, %v3381_v58 }
  0xdb   :  { %v724_v61 = vxor.u32 2147483648, %v723_v60  ;;  %v1777_v30 = vmul.f32 %v3330_v55, %v3330_v55  ;;  %v1675_v34 = vmul.f32 2.0, %v2998_v5  ;;  %vm732_vm0 = vweird.f32 %v3069_v54 }
  0xdc   :  { %vm942_vm13 = vcmp.lt.s32.totalorder %v941_v52, 2  ;;  %v4071_v12 = vxor.u32 2147483648, %v2887_v10  ;;  %v4072_v38 = vxor.u32 2147483648, %v2884_v47  ;;  %vm736_vm12 = vcmp.eq.s32.totalorder %v734_v8, 0 }
  0xdd   :  { %v725_v41 = vsel %vm642_vm4, %v724_v61, %v723_v60  ;;  %v3424_v63 = vsub.f32 %v1769_v32, %v1777_v30  ;;  %v1781_v62 = vmul.f32 %v3361_v23, %v3361_v23  ;;  %vm735_vm10 = vcmp.lt.s32.totalorder %v734_v8, 2 }
  0xde   :  { %1914 = vrot.lane.b32.xlu1 %v3246_v48, %s2538_s23  ;;  %v728_v13 = vsel %vm3350_vm3, %v3069_v54, %v725_v41  ;;  %v1666_v48 = vsel %vm1664_vm6, %v2516_v21, %v841_v37  ;;  %v3395_v21 = vsub.f32 %v1733_v6, %v1741_v39  ;;  %v3398_v37 = vsub.f32 %v1732_v4, %v1740_v25 }
  0xdf   :  { %2519 = vcosq.f32 %v728_v13  ;;  %v1670_v43 = vsel %vm1663_vm7, %v1666_v48, %v1669_v31  ;;  %v945_v19 = vsel %vm943_vm2, %v2884_v47, %v4071_v12  ;;  %v948_v60 = vsel %vm946_vm9, %v4072_v38, %v2887_v10 }
  0xe0   :  { %2521 = vsinq.f32 %v728_v13  ;;  %v3408_v17 = vmul.f32 %v1757_v22, %v3395_v21  ;;  %v3412_v7 = vsel %vm836_vm8, nan, %v1670_v43  ;;  %v3415_v16 = vmul.f32 %v1756_v44, %v3398_v37 }
  0xe1   :  { %vm739_vm8 = vcmp.eq.s32.totalorder %v734_v8, 2  ;;  %v1772_v2 = vmul.f32 %v3398_v37, %v3398_v37  ;;  %v1780_v47 = vmul.f32 %v3364_v11, %v3364_v11  ;;  %v3447_v9 = vmul.f32 %v1675_v34, %v3379_v35 }
  0xe2   :  { %1918 = vrot.lane.b32.xlu1 %v3379_v35, %s2538_s23  ;;  %v949_v31 = vsel %vm942_vm13, %v945_v19, %v948_v60  ;;  %v1793_v48 = vmul.f32 2.0, %v3402_v45  ;;  %v4073_v39 = vxor.u32 2147483648, %v2816_v50  ;;  %v1559_v52 = vand.u32 3, %v3375_v42 }
  0xe3   :  { %v3449_v41 = vsub.f32 %v1772_v2, %v1780_v47  ;;  %v1679_v36 = vmul.f32 2.0, %v3336_v14  ;;  %v950_v43 = vsel %vm108_vm1, nan, %v949_v31  ;;  %v1797_v22 = vmul.f32 2.0, %v3408_v17 }
  0xe4   :  { %v3467_v25 = vmul.f32 %v1793_v48, %v3424_v63  ;;  %v1809_v42 = vmul.f32 %v3424_v63, %v3424_v63  ;;  %vm1561_vm4 = vcmp.eq.s32.totalorder %v1559_v52, 0  ;;  %vm1564_vm5 = vcmp.eq.s32.totalorder %v1559_v52, 2 }
  0xe5   :  { %v3490_v32 = vmul.f32 %v1679_v36, %v3412_v7  ;;  %v1817_v30 = vmul.f32 %v3402_v45, %v3402_v45  ;;  %vm1560_vm1 = vcmp.lt.s32.totalorder %v1559_v52, 2  ;;  %v1699_v19 = vmul.f32 %v2998_v5, %v2998_v5 }
  0xe6   :  { %1922 = vrot.lane.b32.xlu1 %v3300_v29, %s2538_s23  ;;  %v1147_v29 = vand.u32 3, %v2715_v20  ;;  %v1773_v20 = vmul.f32 %v3395_v21, %v3395_v21  ;;  %v1691_v0 = vmul.f32 %v3379_v35, %v3379_v35  ;;  %v1812_v38 = vmul.f32 %v3449_v41, %v3449_v41 }
  0xe7   :  { %v3494_v12 = vsub.f32 %v1809_v42, %v1817_v30  ;;  %v1820_v5 = vmul.f32 %v3415_v16, %v3415_v16  ;;  %v1672_v35 = vmul.f32 2.0, %v2911_v15  ;;  %v1833_v47 = vmul.f32 2.0, %v3467_v25 }
  0xe8   :  { %vm1149_vm14 = vcmp.eq.s32.totalorder %v1147_v29, 0  ;;  %vm1152_vm15 = vcmp.eq.s32.totalorder %v1147_v29, 2  ;;  %v3442_v26 = vsub.f32 %v1773_v20, %v1781_v62  ;;  %vm1148_vm3 = vcmp.lt.s32.totalorder %v1147_v29, 2 }
  0xe9   :  { %v2520_v28 = vpop.eup %2519  ;;  %v1151_v56 = vsel %vm1149_vm14, %v2806_v53, %v4073_v39  ;;  %v1707_v62 = vsub.f32 %v1691_v0, %v1699_v19  ;;  %v3524_v2 = vmul.f32 %v1672_v35, %v950_v43  ;;  %v1695_v54 = vmul.f32 %v3412_v7, %v3412_v7 }
  0xea   :  { %1926 = vrot.lane.b32.xlu1 %v3412_v7, %s2538_s23  ;;  %v2522_v57 = vpop.eup %2521  ;;  %v740_v24 = vxor.u32 2147483648, %v2520_v28  ;;  %v3477_v44 = vmul.f32 %v1797_v22, %v3442_v26  ;;  %v1715_v31 = vmul.f32 2.0, %v3447_v9  ;;  %v1698_v52 = vmul.f32 %v2858_v1, %v2858_v1 }
  0xeb   :  { %v737_v61 = vxor.u32 2147483648, %v2522_v57  ;;  %vm2256_vm6 = vcmask 31744   ;;  %vm2274_vm7 = vcmask 97280   ;;  %vm2283_vm2 = vcmask 130048  }
  0xec   :  { %v741_v10 = vsel %vm739_vm8, %v740_v24, %v2522_v57  ;;  %v1566_v29 = vsel %vm1564_vm5, %v740_v24, %v2522_v57  ;;  %v3516_v24 = vsub.f32 %v1812_v38, %v1820_v5  ;;  %v3595_v30 = vmul.f32 %v3477_v44, %v3477_v44 }
  0xed   :  { %v738_v49 = vsel %vm736_vm12, %v2520_v28, %v737_v61  ;;  %v1563_v34 = vsel %vm1561_vm4, %v2520_v28, %v737_v61  ;;  %v1821_v28 = vmul.f32 %v3408_v17, %v3408_v17  ;;  %v1674_v61 = vmul.f32 2.0, %v2858_v1 }
  0xee   :  { %1946 = vrot.lane.b32.xlu1 %v3303_v46, %s2539_s24  ;;  %v742_v13 = vsel %vm735_vm10, %v738_v49, %v741_v10  ;;  %v4074_v46 = vxor.u32 2147483648, %v2806_v53  ;;  %v1567_v60 = vsel %vm1560_vm1, %v1563_v34, %v1566_v29  ;;  %v3533_v10 = vmul.f32 %v1833_v47, %v3494_v12 }
  0xef   :  { %v3455_v6 = vsel %vm732_vm0, nan, %v742_v13  ;;  %v1568_v20 = vsel %vm732_vm0, nan, %v1567_v60  ;;  %v3599_v34 = vmul.f32 %v3516_v24, %v3516_v24  ;;  %v1739_v29 = vmul.f32 %v3447_v9, %v3447_v9 }
  0xf0   :  { %v1154_v4 = vsel %vm1152_vm15, %v4074_v46, %v2816_v50  ;;  %1892 = vrot.lane.b32.xlu0 %v3455_v6, %s2537_s16  ;;  %v1796_v50 = vmul.f32 2.0, %v3415_v16  ;;  %v1678_v13 = vmul.f32 2.0, %v3455_v6  ;;  %v1694_v42 = vmul.f32 %v1568_v20, %v1568_v20 }
  0xf1   :  { %v1155_v53 = vsel %vm1148_vm3, %v1151_v56, %v1154_v4  ;;  %v1688_v56 = vmul.f32 %v950_v43, %v950_v43  ;;  %v3562_v4 = vmul.f32 %v1715_v31, %v1707_v62  ;;  %v1736_v47 = vmul.f32 %v3524_v2, %v3524_v2 }
  0xf2   :  { %1950 = vrot.lane.b32.xlu1 %v3447_v9, %s2539_s24  ;;  %v3483_v3 = vmul.f32 %v1796_v50, %v3449_v41  ;;  %v1156_v8 = vsel %vm316_vm11, nan, %v1155_v53  ;;  %v3558_v46 = vmul.f32 %v1678_v13, %v1568_v20  ;;  %v1702_v50 = vmul.f32 %v3455_v6, %v3455_v6 }
  0xf3   :  { %v1690_v36 = vmul.f32 %v1156_v8, %v1156_v8  ;;  %v1731_v6 = vmul.f32 %v1707_v62, %v1707_v62  ;;  %v1779_v31 = vmul.f32 %v3562_v4, %v3562_v4  ;;  %vm2265_vm11 = vcmask 64512  }
  0xf4   :  { %1912 = vrot.lane.b32.xlu0 %v950_v43, %s2538_s23  ;;  %v1836_v7 = vmul.f32 2.0, %v3483_v3  ;;  %v3570_v43 = vmul.f32 %v3494_v12, %v3494_v12  ;;  %vm2292_vm9 = vcmask 162816   ;;  %vm2301_vm0 = vcmask 195584  }
  0xf5   :  { %v1706_v22 = vsub.f32 %v1690_v36, %v1698_v52  ;;  %v1747_v38 = vsub.f32 %v1731_v6, %v1739_v29  ;;  %vm2310_vm8 = vcmask 228352   ;;  %vm2319_vm13 = vcmask 261120  }
  0xf6   :  { %1954 = vrot.lane.b32.xlu1 %v3316_v59, %s2539_s24  ;;  %v1813_v59 = vmul.f32 %v3442_v26, %v3442_v26  ;;  %v3552_v39 = vmul.f32 %v1836_v7, %v3516_v24  ;;  %vm2328_vm12 = vcmask 293888   ;;  %vm2337_vm10 = vcmask 326656  }
  0xf7   :  { %v1771_v7 = vmul.f32 %v1747_v38, %v1747_v38  ;;  %vm2346_vm14 = vcmask 359424   ;;  %vm2355_vm15 = vcmask 392192   ;;  %vm2364_vm3 = vcmask 424960  }
  0xf8   :  { %1916 = vrot.lane.b32.xlu0 %v1156_v8, %s2538_s23  ;;  %v3511_v57 = vsub.f32 %v1813_v59, %v1821_v28  ;;  %v1710_v59 = vsub.f32 %v1694_v42, %v1702_v50  ;;  %v1712_v28 = vmul.f32 2.0, %v3524_v2 }
  0xfa   :  { %1958 = vrot.lane.b32.xlu1 %v3490_v32, %s2539_s24  ;;  %v1734_v13 = vmul.f32 %v1710_v59, %v1710_v59 }
  0xfc   :  { %1920 = vrot.lane.b32.xlu0 %v3307_v18, %s2538_s23  ;;  %v1703_v18 = vmul.f32 %v3336_v14, %v3336_v14  ;;  %v1837_v14 = vmul.f32 2.0, %v3477_v44 }
  0xfe   :  { %1978 = vrot.lane.b32.xlu1 %v3321_v40, %s2540_s25  ;;  %v3537_v40 = vmul.f32 %v1674_v61, %v1156_v8  ;;  %v1711_v49 = vsub.f32 %v1695_v54, %v1703_v18  ;;  %v3549_v48 = vmul.f32 %v1837_v14, %v3511_v57  ;;  %v3591_v8 = vmul.f32 %v3511_v57, %v3511_v57 }
  0xff   :  { %v1730_v54 = vmul.f32 %v1706_v22, %v1706_v22  ;;  %v1742_v14 = vmul.f32 %v3558_v46, %v3558_v46 }
 0x100   :  { %1924 = vrot.lane.b32.xlu0 %v1568_v20, %s2538_s23  ;;  %v1869_v19 = vsub.f32 %v3591_v8, %v3595_v30  ;;  %v1714_v60 = vmul.f32 2.0, %v3537_v40  ;;  %v1735_v5 = vmul.f32 %v1711_v49, %v1711_v49  ;;  %v1718_v20 = vmul.f32 2.0, %v3558_v46 }
 0x102   :  { %1982 = vrot.lane.b32.xlu1 %v1707_v62, %s2540_s25  ;;  %v3627_v35 = vmul.f32 %v1714_v60, %v1706_v22  ;;  %v1755_v62 = vmul.f32 2.0, %v3562_v4 }
 0x104   :  { %1944 = vrot.lane.b32.xlu0 %v3524_v2, %s2539_s24  ;;  %v1754_v36 = vmul.f32 2.0, %v3627_v35 }
 0x106   :  { %1986 = vrot.lane.b32.xlu1 %v3323_v27, %s2540_s25  ;;  %v1696_v27 = vmul.f32 %v2911_v15, %v2911_v15 }
 0x108   :  { %1948 = vrot.lane.b32.xlu0 %v3537_v40, %s2539_s24  ;;  %v1704_v15 = vsub.f32 %v1688_v56, %v1696_v27  ;;  %v1787_v56 = vsub.f32 %v1771_v7, %v1779_v31  ;;  %v2526_v31 = vld [vmem:[%s4038_s0 + $0x38] sm:$0xff] }
 0x10a   :  { %1990 = vrot.lane.b32.xlu1 %v1711_v49, %s2540_s25  ;;  %v3619_v9 = vmul.f32 %v1712_v28, %v1704_v15  ;;  %v1728_v61 = vmul.f32 %v1704_v15, %v1704_v15 }
 0x10c   :  { %1952 = vrot.lane.b32.xlu0 %v3319_v51, %s2539_s24  ;;  %v3574_v51 = vmul.f32 %v3467_v25, %v3467_v25  ;;  %v1744_v18 = vsub.f32 %v1728_v61, %v1736_v47  ;;  %v1752_v27 = vmul.f32 2.0, %v3619_v9  ;;  %v1776_v29 = vmul.f32 %v3619_v9, %v3619_v9 }
 0x10e   :  { %2010 = vrot.lane.b32.xlu1 %v3330_v55, %s2541_s26  ;;  %v1719_v55 = vmul.f32 2.0, %v3490_v32  ;;  %v1865_v1 = vsub.f32 %v3570_v43, %v3574_v51  ;;  %v3673_v52 = vmul.f32 %v1752_v27, %v1744_v18  ;;  %v1768_v6 = vmul.f32 %v1744_v18, %v1744_v18 }
 0x110   :  { %1956 = vrot.lane.b32.xlu0 %v3558_v46, %s2539_s24  ;;  %v3584_v53 = vmul.f32 %v1719_v55, %v1711_v49 }
 0x112   :  { %2014 = vrot.lane.b32.xlu1 %v3562_v4, %s2541_s26  ;;  %v1759_v49 = vmul.f32 2.0, %v3584_v53 }
 0x114   :  { %1976 = vrot.lane.b32.xlu0 %v1704_v15, %s2540_s25 }
 0x116   :  { %2018 = vrot.lane.b32.xlu1 %v3361_v23, %s2541_s26  ;;  %v3603_v23 = vmul.f32 %v3483_v3, %v3483_v3 }
 0x118   :  { %1980 = vrot.lane.b32.xlu0 %v1706_v22, %s2540_s25  ;;  %v1868_v0 = vsub.f32 %v3599_v34, %v3603_v23  ;;  %v3687_v22 = vpop.permute.xlu0 %1880 }
 0x11a   :  { %2022 = vrot.lane.b32.xlu1 %v3584_v53, %s2541_s26 }
 0x11c   :  { %1984 = vrot.lane.b32.xlu0 %v3325_v33, %s2540_s25  ;;  %v1743_v33 = vmul.f32 %v3490_v32, %v3490_v32  ;;  %v3638_v32 = vmul.f32 %v1718_v20, %v1710_v59  ;;  %v2524_v20 = vld [vmem:[%s4038_s0 + $0x18] sm:$0xff] }
 0x11e   :  { %2042 = vrot.lane.b32.xlu1 %v3381_v58, %s2542_s27  ;;  %v1751_v58 = vsub.f32 %v1735_v5, %v1743_v33  ;;  %v1758_v50 = vmul.f32 2.0, %v3638_v32 }
 0x120   :  { %1988 = vrot.lane.b32.xlu0 %v1710_v59, %s2540_s25  ;;  %v1775_v4 = vmul.f32 %v1751_v58, %v1751_v58  ;;  %v1883_v59 = vpop.permute.xlu0 %1882 }
 0x122   :  { %2046 = vrot.lane.b32.xlu1 %v1747_v38, %s2542_s27 }
 0x124   :  { %2008 = vrot.lane.b32.xlu0 %v3619_v9, %s2541_s26  ;;  %v3711_v9 = vsub.f32 %v1768_v6, %v1776_v29 }
 0x126   :  { %2050 = vrot.lane.b32.xlu1 %v3395_v21, %s2542_s27  ;;  %v3644_v21 = vmul.f32 %v1755_v62, %v1747_v38  ;;  %v2523_v38 = vld [vmem:[%s4038_s0 + $0x8] sm:$0xff] }
 0x128   :  { %2012 = vrot.lane.b32.xlu0 %v3627_v35, %s2541_s26  ;;  %v1819_v7 = vmul.f32 %v3644_v21, %v3644_v21 }
 0x12a   :  { %2054 = vrot.lane.b32.xlu1 %v1751_v58, %s2542_s27 }
 0x12c   :  { %2016 = vrot.lane.b32.xlu0 %v3364_v11, %s2541_s26  ;;  %v1738_v11 = vmul.f32 %v3537_v40, %v3537_v40  ;;  %v3663_v40 = vpop.permute.xlu1 %1884 }
 0x12e   :  { %2074 = vrot.lane.b32.xlu1 %v3402_v45, %s2543_s28  ;;  %v1746_v2 = vsub.f32 %v1730_v54, %v1738_v11  ;;  %v3656_v45 = vmul.f32 %v1759_v49, %v1751_v58  ;;  %v2525_v54 = vld [vmem:[%s4038_s0 + $0x28] sm:$0xff] }
 0x130   :  { %2020 = vrot.lane.b32.xlu0 %v3638_v32, %s2541_s26  ;;  %v1887_v46 = vpop.permute.xlu1 %1886  ;;  %v3681_v15 = vmul.f32 %v1754_v36, %v1746_v2  ;;  %v1770_v5 = vmul.f32 %v1746_v2, %v1746_v2  ;;  %v1799_v58 = vmul.f32 2.0, %v3656_v45  ;;  %v1792_v36 = vmul.f32 2.0, %v3673_v52 }
 0x131   :  { %v2260_v62 = vsel %vm2256_vm6, %v2524_v20, %v1887_v46 }
 0x132   :  { %2078 = vrot.lane.b32.xlu1 %v3644_v21, %s2543_s28 }
 0x134   :  { %2040 = vrot.lane.b32.xlu0 %v1744_v18, %s2542_s27 }
 0x136   :  { %2082 = vrot.lane.b32.xlu1 %v3408_v17, %s2543_s28  ;;  %v1750_v17 = vsub.f32 %v1734_v13, %v1742_v14  ;;  %v1782_v13 = vmul.f32 %v3638_v32, %v3638_v32  ;;  %v1889_v32 = vpop.permute.xlu0 %1888 }
 0x138   :  { %2044 = vrot.lane.b32.xlu0 %v1746_v2, %s2542_s27  ;;  %v1774_v2 = vmul.f32 %v1750_v17, %v1750_v17 }
 0x13a   :  { %2086 = vrot.lane.b32.xlu1 %v3656_v45, %s2543_s28 }
 0x13c   :  { %2048 = vrot.lane.b32.xlu0 %v3398_v37, %s2542_s27  ;;  %v1783_v37 = vmul.f32 %v3584_v53, %v3584_v53  ;;  %v1795_v53 = vmul.f32 2.0, %v3644_v21 }
 0x13e   :  { %2106 = vrot.lane.b32.xlu1 %v3424_v63, %s2544_s29  ;;  %v1891_v63 = vpop.permute.xlu1 %1890  ;;  %v3685_v55 = vsub.f32 %v1775_v4, %v1783_v37  ;;  %v3703_v28 = vmul.f32 %v1795_v53, %v1787_v56  ;;  %v1794_v37 = vmul.f32 2.0, %v3681_v15 }
 0x13f   :  { %v2262_v11 = vsel %vm2256_vm6, %v2525_v54, %v1891_v63  ;;  %v1816_v54 = vmul.f32 %v3673_v52, %v3673_v52 }
 0x140   :  { %2052 = vrot.lane.b32.xlu0 %v1750_v17, %s2542_s27  ;;  %v3731_v18 = vmul.f32 %v1799_v58, %v3685_v55 }
 0x142   :  { %2110 = vrot.lane.b32.xlu1 %v1787_v56, %s2544_s29  ;;  %v1863_v51 = vmul.f32 %v3731_v18, %v3731_v18 }
 0x144   :  { %2072 = vrot.lane.b32.xlu0 %v3673_v52, %s2543_s28 }
 0x146   :  { %2114 = vrot.lane.b32.xlu1 %v3442_v26, %s2544_s29  ;;  %v3697_v26 = vmul.f32 %v1758_v50, %v1750_v17  ;;  %v3752_v17 = vsub.f32 %v1774_v2, %v1782_v13  ;;  %v1823_v50 = vmul.f32 %v3656_v45, %v3656_v45 }
 0x148   :  { %2076 = vrot.lane.b32.xlu0 %v3681_v15, %s2543_s28 }
 0x14a   :  { %2118 = vrot.lane.b32.xlu1 %v3685_v55, %s2544_s29 }
 0x14c   :  { %v1895_v42 = vpop.permute.xlu1 %1894  ;;  %2080 = vrot.lane.b32.xlu0 %v3415_v16, %s2543_s28  ;;  %v2258_v16 = vsel %vm2256_vm6, %v2523_v38, %v1883_v59 }
 0x14d   :  { %v2264_v27 = vsel %vm2256_vm6, %v2526_v31, %v1895_v42  ;;  %v2530_v31 = vld [vmem:[%s4038_s0 + $0x30] sm:$0xff] }
 0x14e   :  { %2138 = vrot.lane.b32.xlu1 %v3467_v25, %s2545_s30  ;;  %v1778_v25 = vmul.f32 %v3627_v35, %v3627_v35 }
 0x150   :  { %v1915_v60 = vpop.permute.xlu1 %1914  ;;  %2084 = vrot.lane.b32.xlu0 %v3697_v26, %s2543_s28  ;;  %v3725_v47 = vsub.f32 %v1770_v5, %v1778_v25  ;;  %v1798_v5 = vmul.f32 2.0, %v3697_v26  ;;  %v1835_v25 = vmul.f32 2.0, %v3703_v28 }
 0x151   :  { %v2267_v33 = vsel %vm2265_vm11, %v2258_v16, %v1915_v60 }
 0x152   :  { %2142 = vrot.lane.b32.xlu1 %v3703_v28, %s2545_s30  ;;  %v3776_v6 = vmul.f32 %v1794_v37, %v3725_v47 }
 0x154   :  { %v1919_v61 = vpop.permute.xlu1 %1918  ;;  %2104 = vrot.lane.b32.xlu0 %v3711_v9, %s2544_s29 }
 0x155   :  { %v2269_v35 = vsel %vm2265_vm11, %v2260_v62, %v1919_v61  ;;  %v3805_v61 = vmul.f32 %v1798_v5, %v3752_v17  ;;  %v1834_v5 = vmul.f32 2.0, %v3776_v6 }
 0x156   :  { %2146 = vrot.lane.b32.xlu1 %v3477_v44, %s2545_s30  ;;  %v1811_v44 = vmul.f32 %v1787_v56, %v1787_v56 }
 0x158   :  { %v1923_v49 = vpop.permute.xlu1 %1922  ;;  %2108 = vrot.lane.b32.xlu0 %v3725_v47, %s2544_s29  ;;  %v3758_v21 = vsub.f32 %v1811_v44, %v1819_v7  ;;  %v1839_v7 = vmul.f32 2.0, %v3731_v18 }
 0x159   :  { %v2271_v14 = vsel %vm2265_vm11, %v2262_v11, %v1923_v49 }
 0x15a   :  { %2150 = vrot.lane.b32.xlu1 %v3731_v18, %s2545_s30 }
 0x15c   :  { %v1927_v46 = vpop.permute.xlu1 %1926  ;;  %2112 = vrot.lane.b32.xlu0 %v3449_v41, %s2544_s29  ;;  %v3763_v41 = vmul.f32 %v1792_v36, %v3711_v9 }
 0x15d   :  { %v2273_v56 = vsel %vm2265_vm11, %v2264_v27, %v1927_v46 }
 0x15e   :  { %2170 = vrot.lane.b32.xlu1 %v3494_v12, %s2546_s10  ;;  %v1815_v12 = vmul.f32 %v3685_v55, %v3685_v55  ;;  %v2527_v55 = vld [vmem:[%s4038_s0] sm:$0xff] }
 0x15f   :  { %v2257_v45 = vsel %vm2256_vm6, %v2527_v55, %v3687_v22  ;;  %v2528_v22 = vld [vmem:[%s4038_s0 + $0x10] sm:$0xff] }
 0x160   :  { %v1947_v4 = vpop.permute.xlu1 %1946  ;;  %2116 = vrot.lane.b32.xlu0 %v3752_v17, %s2544_s29  ;;  %v3781_v59 = vsub.f32 %v1815_v12, %v1823_v50  ;;  %v1814_v12 = vmul.f32 %v3752_v17, %v3752_v17  ;;  %v1822_v50 = vmul.f32 %v3697_v26, %v3697_v26  ;;  %v1832_v26 = vmul.f32 2.0, %v3763_v41 }
 0x161   :  { %v2276_v63 = vsel %vm2274_vm7, %v2267_v33, %v1947_v4  ;;  %v2259_v33 = vsel %vm2256_vm6, %v2528_v22, %v3663_v40  ;;  %v1843_v40 = vmul.f32 %v1835_v25, %v3758_v21 }
 0x162   :  { %2174 = vrot.lane.b32.xlu1 %v3758_v21, %s2546_s10  ;;  %v1893_v53 = vpop.permute.xlu0 %1892  ;;  %v1830_v17 = vsub.f32 %v1814_v12, %v1822_v50  ;;  %v1855_v43 = vmul.f32 %v3781_v59, %v3781_v59 }
 0x163   :  { %v2263_v27 = vsel %vm2256_vm6, %v2530_v31, %v1893_v53 }
 0x164   :  { %v1951_v42 = vpop.permute.xlu1 %1950  ;;  %2136 = vrot.lane.b32.xlu0 %v3763_v41, %s2545_s30 }
 0x165   :  { %v2278_v29 = vsel %vm2274_vm7, %v2269_v35, %v1951_v42  ;;  %v1808_v35 = vmul.f32 %v3711_v9, %v3711_v9  ;;  %v1859_v42 = vmul.f32 %v3703_v28, %v3703_v28 }
 0x166   :  { %2178 = vrot.lane.b32.xlu1 %v3511_v57, %s2546_s10  ;;  %v1913_v38 = vpop.permute.xlu0 %1912 }
 0x167   :  { %v2266_v16 = vsel %vm2265_vm11, %v2257_v45, %v1913_v38  ;;  %v3822_v52 = vsub.f32 %v1808_v35, %v1816_v54  ;;  %v1838_v35 = vmul.f32 2.0, %v3805_v61 }
 0x168   :  { %v1955_v60 = vpop.permute.xlu1 %1954  ;;  %2140 = vrot.lane.b32.xlu0 %v3776_v6, %s2545_s30 }
 0x169   :  { %v2280_v57 = vsel %vm2274_vm7, %v2271_v14, %v1955_v60  ;;  %v1818_v14 = vmul.f32 %v3681_v15, %v3681_v15  ;;  %v1846_v8 = vmul.f32 %v1838_v35, %v1830_v17  ;;  %v1848_v30 = vmul.f32 %v3822_v52, %v3822_v52 }
 0x16a   :  { %2182 = vrot.lane.b32.xlu1 %v3781_v59, %s2546_s10  ;;  %v1917_v58 = vpop.permute.xlu0 %1916 }
 0x16b   :  { %v2268_v20 = vsel %vm2265_vm11, %v2259_v33, %v1917_v58 }
 0x16c   :  { %v1959_v62 = vpop.permute.xlu1 %1958  ;;  %2144 = vrot.lane.b32.xlu0 %v3483_v3, %s2545_s30  ;;  %v2529_v3 = vld [vmem:[%s4038_s0 + $0x20] sm:$0xff]  ;;  %s2548_s0 = smov 48  }
 0x16d   :  { %v2282_v11 = vsel %vm2274_vm7, %v2273_v56, %v1959_v62  ;;  %v2261_v49 = vsel %vm2256_vm6, %v2529_v3, %v1889_v32  ;;  %v1847_v56 = vmul.f32 %v1839_v7, %v3781_v59 }
 0x16e   :  { %2202 = vrot.lane.b32.xlu1 %v3533_v10, %s2547_s15  ;;  %v1921_v2 = vpop.permute.xlu0 %1920  ;;  %v1810_v10 = vmul.f32 %v3725_v47, %v3725_v47 }
 0x16f   :  { %v2270_v9 = vsel %vm2265_vm11, %v2261_v49, %v1921_v2 }
 0x170   :  { %v1979_v13 = vpop.permute.xlu1 %1978  ;;  %2148 = vrot.lane.b32.xlu0 %v3805_v61, %s2545_s30  ;;  %v3838_v15 = vsub.f32 %v1810_v10, %v1818_v14  ;;  %v1858_v14 = vmul.f32 %v3776_v6, %v3776_v6  ;;  %v1862_v6 = vmul.f32 %v3805_v61, %v3805_v61 }
 0x171   :  { %v2285_v44 = vsel %vm2283_vm2, %v2276_v63, %v1979_v13 }
 0x172   :  { %2206 = vrot.lane.b32.xlu1 %v1843_v40, %s2547_s15  ;;  %v1925_v46 = vpop.permute.xlu0 %1924  ;;  %v1842_v33 = vmul.f32 %v1834_v5, %v3838_v15 }
 0x173   :  { %v2272_v32 = vsel %vm2265_vm11, %v2263_v27, %v1925_v46 }
 0x174   :  { %v1983_v36 = vpop.permute.xlu1 %1982  ;;  %2168 = vrot.lane.b32.xlu0 %v3822_v52, %s2546_s10 }
 0x175   :  { %v2287_v47 = vsel %vm2283_vm2, %v2278_v29, %v1983_v36 }
 0x176   :  { %2210 = vrot.lane.b32.xlu1 %v3549_v48, %s2547_s15  ;;  %v1945_v4 = vpop.permute.xlu0 %1944  ;;  %v1851_v48 = vmul.f32 %v3758_v21, %v3758_v21 }
 0x177   :  { %v2275_v37 = vsel %vm2274_vm7, %v2266_v16, %v1945_v4 }
 0x178   :  { %v1987_v63 = vpop.permute.xlu1 %1986  ;;  %2172 = vrot.lane.b32.xlu0 %v3838_v15, %s2546_s10  ;;  %v1867_v28 = vsub.f32 %v1851_v48, %v1859_v42 }
 0x179   :  { %v2289_v53 = vsel %vm2283_vm2, %v2280_v57, %v1987_v63 }
 0x17a   :  { %2214 = vrot.lane.b32.xlu1 %v1847_v56, %s2547_s15  ;;  %v1949_v29 = vpop.permute.xlu0 %1948 }
 0x17b   :  { %v2277_v55 = vsel %vm2274_vm7, %v2268_v20, %v1949_v29  ;;  %v1871_v20 = vsub.f32 %v1855_v43, %v1863_v51 }
 0x17c   :  { %v1991_v45 = vpop.permute.xlu1 %1990  ;;  %2176 = vrot.lane.b32.xlu0 %v3516_v24, %s2546_s10  ;;  %v1840_v24 = vmul.f32 %v1832_v26, %v3822_v52 }
 0x17d   :  { %v2291_v38 = vsel %vm2283_vm2, %v2282_v11, %v1991_v45 }
 0x17e   :  { %2234 = vrot.lane.b32.xlu1 %v1865_v1, %s2548_s0  ;;  %v1953_v21 = vpop.permute.xlu0 %1952 }
 0x17f   :  { %v2279_v16 = vsel %vm2274_vm7, %v2270_v9, %v1953_v21 }
 0x180   :  { %v2011_v60 = vpop.permute.xlu1 %2010  ;;  %2180 = vrot.lane.b32.xlu0 %v1830_v17, %s2546_s10 }
 0x181   :  { %v2294_v57 = vsel %vm2292_vm9, %v2285_v44, %v2011_v60 }
 0x182   :  { %2238 = vrot.lane.b32.xlu1 %v1867_v28, %s2548_s0  ;;  %v1957_v1 = vpop.permute.xlu0 %1956 }
 0x183   :  { %v2281_v25 = vsel %vm2274_vm7, %v2272_v32, %v1957_v1 }
 0x184   :  { %v2015_v22 = vpop.permute.xlu1 %2014  ;;  %2200 = vrot.lane.b32.xlu0 %v1840_v24, %s2547_s15 }
 0x185   :  { %v2296_v58 = vsel %vm2292_vm9, %v2287_v47, %v2015_v22 }
 0x186   :  { %2242 = vrot.lane.b32.xlu1 %v1869_v19, %s2548_s0  ;;  %v1977_v59 = vpop.permute.xlu0 %1976  ;;  %v1856_v19 = vmul.f32 %v3763_v41, %v3763_v41 }
 0x187   :  { %v2284_v62 = vsel %vm2283_vm2, %v2275_v37, %v1977_v59 }
 0x188   :  { %v2019_v18 = vpop.permute.xlu1 %2018  ;;  %2204 = vrot.lane.b32.xlu0 %v1842_v33, %s2547_s15  ;;  %v1864_v10 = vsub.f32 %v1848_v30, %v1856_v19 }
 0x189   :  { %v2298_v54 = vsel %vm2292_vm9, %v2289_v53, %v2019_v18 }
 0x18a   :  { %2246 = vrot.lane.b32.xlu1 %v1871_v20, %s2548_s0  ;;  %v1981_v11 = vpop.permute.xlu0 %1980 }
 0x18b   :  { %v2286_v40 = vsel %vm2283_vm2, %v2277_v55, %v1981_v11 }
 0x18c   :  { %v2023_v3 = vpop.permute.xlu1 %2022  ;;  %2208 = vrot.lane.b32.xlu0 %v3552_v39, %s2547_s15  ;;  %v1850_v39 = vmul.f32 %v3838_v15, %v3838_v15  ;;  %v1854_v15 = vmul.f32 %v1830_v17, %v1830_v17 }
 0x18d   :  { %v2300_v49 = vsel %vm2292_vm9, %v2291_v38, %v2023_v3 }
 0x18e   :  { %v1985_v2 = vpop.permute.xlu0 %1984  ;;  %v1866_v31 = vsub.f32 %v1850_v39, %v1858_v14  ;;  %v1870_v63 = vsub.f32 %v1854_v15, %v1862_v6 }
 0x18f   :  { %v2288_v9 = vsel %vm2283_vm2, %v2279_v16, %v1985_v2 }
 0x190   :  { %v2043_v13 = vpop.permute.xlu1 %2042  ;;  %2212 = vrot.lane.b32.xlu0 %v1846_v8, %s2547_s15 }
 0x191   :  { %v2303_v52 = vsel %vm2301_vm0, %v2294_v57, %v2043_v13 }
 0x192   :  { %v1989_v44 = vpop.permute.xlu0 %1988 }
 0x193   :  { %v2290_v41 = vsel %vm2283_vm2, %v2281_v25, %v1989_v44 }
 0x194   :  { %v2047_v7 = vpop.permute.xlu1 %2046  ;;  %2232 = vrot.lane.b32.xlu0 %v1864_v10, %s2548_s0 }
 0x195   :  { %v2305_v27 = vsel %vm2301_vm0, %v2296_v58, %v2047_v7 }
 0x196   :  { %v2009_v46 = vpop.permute.xlu0 %2008 }
 0x197   :  { %v2293_v32 = vsel %vm2292_vm9, %v2284_v62, %v2009_v46 }
 0x198   :  { %v2051_v36 = vpop.permute.xlu1 %2050  ;;  %2236 = vrot.lane.b32.xlu0 %v1866_v31, %s2548_s0 }
 0x199   :  { %v2307_v47 = vsel %vm2301_vm0, %v2298_v54, %v2051_v36 }
 0x19a   :  { %v2013_v56 = vpop.permute.xlu0 %2012 }
 0x19b   :  { %v2295_v4 = vsel %vm2292_vm9, %v2286_v40, %v2013_v56 }
 0x19c   :  { %v2055_v37 = vpop.permute.xlu1 %2054  ;;  %2240 = vrot.lane.b32.xlu0 %v1868_v0, %s2548_s0 }
 0x19d   :  { %v2309_v12 = vsel %vm2301_vm0, %v2300_v49, %v2055_v37 }
 0x19e   :  { %v2017_v50 = vpop.permute.xlu0 %2016 }
 0x19f   :  { %v2297_v53 = vsel %vm2292_vm9, %v2288_v9, %v2017_v50 }
 0x1a0   :  { %v2075_v48 = vpop.permute.xlu1 %2074  ;;  %2244 = vrot.lane.b32.xlu0 %v1870_v63, %s2548_s0 }
 0x1a1   :  { %v2312_v61 = vsel %vm2310_vm8, %v2303_v52, %v2075_v48 }
 0x1a2   :  { %v2021_v42 = vpop.permute.xlu0 %2020 }
 0x1a3   :  { %v2299_v29 = vsel %vm2292_vm9, %v2290_v41, %v2021_v42 }
 0x1a4   :  { %v2079_v55 = vpop.permute.xlu1 %2078 }
 0x1a5   :  { %v2314_v45 = vsel %vm2310_vm8, %v2305_v27, %v2079_v55 }
 0x1a6   :  { %v2041_v34 = vpop.permute.xlu0 %2040 }
 0x1a7   :  { %v2302_v23 = vsel %vm2301_vm0, %v2293_v32, %v2041_v34 }
 0x1a8   :  { %v2083_v0 = vpop.permute.xlu1 %2082 }
 0x1a9   :  { %v3925_v17 = vsel %vm2310_vm8, %v2307_v47, %v2083_v0 }
 0x1aa   :  { %v2045_v26 = vpop.permute.xlu0 %2044 }
 0x1ab   :  { %v2304_v38 = vsel %vm2301_vm0, %v2295_v4, %v2045_v26 }
 0x1ac   :  { %v2087_v28 = vpop.permute.xlu1 %2086 }
 0x1ad   :  { %v3929_v21 = vsel %vm2310_vm8, %v2309_v12, %v2087_v28 }
 0x1ae   :  { %v2049_v16 = vpop.permute.xlu0 %2048 }
 0x1af   :  { %v2306_v60 = vsel %vm2301_vm0, %v2297_v53, %v2049_v16 }
 0x1b0   :  { %v2107_v24 = vpop.permute.xlu1 %2106 }
 0x1b1   :  { %v2321_v32 = vsel %vm2319_vm13, %v2312_v61, %v2107_v24 }
 0x1b2   :  { %v2053_v5 = vpop.permute.xlu0 %2052 }
 0x1b3   :  { %v2308_v57 = vsel %vm2301_vm0, %v2299_v29, %v2053_v5 }
 0x1b4   :  { %v2111_v43 = vpop.permute.xlu1 %2110 }
 0x1b5   :  { %v2323_v4 = vsel %vm2319_vm13, %v2314_v45, %v2111_v43 }
 0x1b6   :  { %v2073_v51 = vpop.permute.xlu0 %2072 }
 0x1b7   :  { %v3934_v1 = vsel %vm2310_vm8, %v2302_v23, %v2073_v51 }
 0x1b8   :  { %v2115_v25 = vpop.permute.xlu1 %2114 }
 0x1b9   :  { %v2325_v61 = vsel %vm2319_vm13, %v3925_v17, %v2115_v25 }
 0x1ba   :  { %v2077_v22 = vpop.permute.xlu0 %2076 }
 0x1bb   :  { %v3937_v33 = vsel %vm2310_vm8, %v2304_v38, %v2077_v22 }
 0x1bc   :  { %v2119_v58 = vpop.permute.xlu1 %2118 }
 0x1bd   :  { %v2327_v0 = vsel %vm2319_vm13, %v3929_v21, %v2119_v58 }
 0x1be   :  { %v2081_v20 = vpop.permute.xlu0 %2080 }
 0x1bf   :  { %v3940_v59 = vsel %vm2310_vm8, %v2306_v60, %v2081_v20 }
 0x1c0   :  { %v2139_v62 = vpop.permute.xlu1 %2138 }
 0x1c1   :  { %v2330_v36 = vsel %vm2328_vm12, %v2321_v32, %v2139_v62 }
 0x1c2   :  { %v2085_v18 = vpop.permute.xlu0 %2084 }
 0x1c3   :  { %v3943_v35 = vsel %vm2310_vm8, %v2308_v57, %v2085_v18 }
 0x1c4   :  { %v2143_v54 = vpop.permute.xlu1 %2142 }
 0x1c5   :  { %v2332_v63 = vsel %vm2328_vm12, %v2323_v4, %v2143_v54 }
 0x1c6   :  { %v2105_v11 = vpop.permute.xlu0 %2104 }
 0x1c7   :  { %v2320_v57 = vsel %vm2319_vm13, %v3934_v1, %v2105_v11 }
 0x1c8   :  { %v2147_v40 = vpop.permute.xlu1 %2146 }
 0x1c9   :  { %v2334_v29 = vsel %vm2328_vm12, %v2325_v61, %v2147_v40 }
 0x1ca   :  { %v3945_v3 = vpop.permute.xlu0 %2108 }
 0x1cb   :  { %v2322_v58 = vsel %vm2319_vm13, %v3937_v33, %v3945_v3 }
 0x1cc   :  { %v2151_v8 = vpop.permute.xlu1 %2150 }
 0x1cd   :  { %v2336_v26 = vsel %vm2328_vm12, %v2327_v0, %v2151_v8 }
 0x1ce   :  { %v3947_v30 = vpop.permute.xlu0 %2112 }
 0x1cf   :  { %v2324_v11 = vsel %vm2319_vm13, %v3940_v59, %v3947_v30 }
 0x1d0   :  { %v2171_v19 = vpop.permute.xlu1 %2170 }
 0x1d1   :  { %v2339_v15 = vsel %vm2337_vm10, %v2330_v36, %v2171_v19 }
 0x1d2   :  { %v3949_v49 = vpop.permute.xlu0 %2116 }
 0x1d4   :  { %v2175_v2 = vpop.permute.xlu1 %2174 }
 0x1d5   :  { %v2341_v12 = vsel %vm2337_vm10, %v2332_v63, %v2175_v2  ;;  %v2326_v2 = vsel %vm2319_vm13, %v3943_v35, %v3949_v49 }
 0x1d6   :  { %v2137_v9 = vpop.permute.xlu0 %2136 }
 0x1d7   :  { %v2329_v43 = vsel %vm2328_vm12, %v2320_v57, %v2137_v9 }
 0x1d8   :  { %v2179_v13 = vpop.permute.xlu1 %2178 }
 0x1d9   :  { %v2343_v55 = vsel %vm2337_vm10, %v2334_v29, %v2179_v13 }
 0x1da   :  { %v2141_v10 = vpop.permute.xlu0 %2140 }
 0x1db   :  { %v2331_v62 = vsel %vm2328_vm12, %v2322_v58, %v2141_v10 }
 0x1dc   :  { %v2183_v39 = vpop.permute.xlu1 %2182 }
 0x1dd   :  { %v2345_v38 = vsel %vm2337_vm10, %v2336_v26, %v2183_v39 }
 0x1de   :  { %v3951_v14 = vpop.permute.xlu0 %2144 }
 0x1df   :  { %v2333_v40 = vsel %vm2328_vm12, %v2324_v11, %v3951_v14 }
 0x1e0   :  { %v2203_v52 = vpop.permute.xlu1 %2202 }
 0x1e1   :  { %v2348_v47 = vsel %vm2346_vm14, %v2339_v15, %v2203_v52 }
 0x1e2   :  { %v3953_v44 = vpop.permute.xlu0 %2148 }
 0x1e3   :  { %v2335_v30 = vsel %vm2328_vm12, %v2326_v2, %v3953_v44 }
 0x1e4   :  { %v2207_v41 = vpop.permute.xlu1 %2206 }
 0x1e5   :  { %v2350_v53 = vsel %vm2346_vm14, %v2341_v12, %v2207_v41 }
 0x1e6   :  { %v2169_v7 = vpop.permute.xlu0 %2168 }
 0x1e7   :  { %v2338_v51 = vsel %vm2337_vm10, %v2329_v43, %v2169_v7 }
 0x1e8   :  { %v2211_v31 = vpop.permute.xlu1 %2210 }
 0x1e9   :  { %v2352_v34 = vsel %vm2346_vm14, %v2343_v55, %v2211_v31 }
 0x1ea   :  { %v2173_v27 = vpop.permute.xlu0 %2172 }
 0x1eb   :  { %v2340_v1 = vsel %vm2337_vm10, %v2331_v62, %v2173_v27 }
 0x1ec   :  { %v2215_v46 = vpop.permute.xlu1 %2214 }
 0x1ed   :  { %v2354_v16 = vsel %vm2346_vm14, %v2345_v38, %v2215_v46 }
 0x1ee   :  { %v2177_v6 = vpop.permute.xlu0 %2176 }
 0x1ef   :  { %v2342_v3 = vsel %vm2337_vm10, %v2333_v40, %v2177_v6 }
 0x1f0   :  { %v2235_v56 = vpop.permute.xlu1 %2234 }
 0x1f1   :  { %v2357_v37 = vsel %vm2355_vm15, %v2348_v47, %v2235_v56 }
 0x1f2   :  { %2366 = vst.msk [vmem:[%s4039_s1 + $0x8] sm:$0xff] %vm2364_vm3, %v2357_v37  ;;  %v2181_v50 = vpop.permute.xlu0 %2180 }
 0x1f3   :  { %v2344_v9 = vsel %vm2337_vm10, %v2335_v30, %v2181_v50 }
 0x1f4   :  { %v2239_v48 = vpop.permute.xlu1 %2238 }
 0x1f5   :  { %v2359_v42 = vsel %vm2355_vm15, %v2350_v53, %v2239_v48 }
 0x1f6   :  { %2368 = vst.msk [vmem:[%s4039_s1 + $0x18] sm:$0xff] %vm2364_vm3, %v2359_v42  ;;  %v2201_v45 = vpop.permute.xlu0 %2200 }
 0x1f7   :  { %v2347_v25 = vsel %vm2346_vm14, %v2338_v51, %v2201_v45 }
 0x1f8   :  { %v2243_v23 = vpop.permute.xlu1 %2242 }
 0x1f9   :  { %v2361_v17 = vsel %vm2355_vm15, %v2352_v34, %v2243_v23 }
 0x1fa   :  { %2370 = vst.msk [vmem:[%s4039_s1 + $0x28] sm:$0xff] %vm2364_vm3, %v2361_v17  ;;  %v2205_v28 = vpop.permute.xlu0 %2204 }
 0x1fb   :  { %v2349_v18 = vsel %vm2346_vm14, %v2340_v1, %v2205_v28 }
 0x1fc   :  { %v2247_v60 = vpop.permute.xlu1 %2246 }
 0x1fd   :  { %v2363_v24 = vsel %vm2355_vm15, %v2354_v16, %v2247_v60 }
 0x1fe   :  { %2372 = vst.msk [vmem:[%s4039_s1 + $0x38] sm:$0xff] %vm2364_vm3, %v2363_v24  ;;  %v2209_v21 = vpop.permute.xlu0 %2208 }
 0x1ff   :  { %v2351_v8 = vsel %vm2346_vm14, %v2342_v3, %v2209_v21 }
 0x202   :  { %v2213_v5 = vpop.permute.xlu0 %2212 }
 0x203   :  { %v2353_v13 = vsel %vm2346_vm14, %v2344_v9, %v2213_v5 }
 0x206   :  { %v2233_v22 = vpop.permute.xlu0 %2232 }
 0x207   :  { %v2356_v20 = vsel %vm2355_vm15, %v2347_v25, %v2233_v22 }
 0x208   :  { %2365 = vst.msk [vmem:[%s4039_s1] sm:$0xff] %vm2364_vm3, %v2356_v20 }
 0x20a   :  { %v2237_v54 = vpop.permute.xlu0 %2236 }
 0x20b   :  { %v2358_v33 = vsel %vm2355_vm15, %v2349_v18, %v2237_v54 }
 0x20c   :  { %2367 = vst.msk [vmem:[%s4039_s1 + $0x10] sm:$0xff] %vm2364_vm3, %v2358_v33 }
 0x20e   :  { %v2241_v19 = vpop.permute.xlu0 %2240 }
 0x20f   :  { %v2360_v59 = vsel %vm2355_vm15, %v2351_v8, %v2241_v19 }
 0x210   :  { %2369 = vst.msk [vmem:[%s4039_s1 + $0x20] sm:$0xff] %vm2364_vm3, %v2360_v59 }
 0x212   :  { %v2245_v10 = vpop.permute.xlu0 %2244 }
 0x213   :  { %v2362_v39 = vsel %vm2355_vm15, %v2353_v13, %v2245_v10 }
 0x214   :  { %2371 = vst.msk [vmem:[%s4039_s1 + $0x30] sm:$0xff] %vm2364_vm3, %v2362_v39 }

</bundles_post_ra>
